<compile_context>
chip_gen: v7x
topology: tpu7x:2x2x1
jax: 0.10.0
libtpu: 0.0.40
codegen_flags: <defaults>
</compile_context>

<pallas_src>
import jax
import jax.numpy as jnp
from jax.experimental import pallas as pl
from jax.experimental.pallas import tpu as pltpu

D_IN, H, D_OUT = 555, 600, 1
D_IN_PAD, H_PAD = 640, 640  # lane-aligned (multiples of 128)


def _round_up(n, m):
    return (n + m - 1) // m * m


def mlp_kernel(x_ref, w1_ref, b1_ref, w2_ref, b2_ref, w3_ref, b3_ref,
               w4_ref, b4_ref, o_ref):
    # Layers 1-3: bf16 operands on the MXU, f32 accumulation; bias/ReLU in f32.
    h = jnp.dot(x_ref[...], w1_ref[...],
                preferred_element_type=jnp.float32) + b1_ref[...]
    h = jnp.maximum(h, 0.0)
    h = jnp.dot(h.astype(jnp.bfloat16), w2_ref[...],
                preferred_element_type=jnp.float32) + b2_ref[...]
    h = jnp.maximum(h, 0.0)
    h = jnp.dot(h.astype(jnp.bfloat16), w3_ref[...],
                preferred_element_type=jnp.float32) + b3_ref[...]
    h = jnp.maximum(h, 0.0)
    # Final 600 -> 1 layer on the VPU/XLU: elementwise mul + lane reduce.
    out = jnp.sum(h * w4_ref[...].astype(jnp.float32), axis=-1, keepdims=True)
    o_ref[...] = (out + b4_ref[...]).astype(o_ref.dtype)


def _pick_batch_tile(batch):
    # Small batches: one grid step holding the whole (8-row aligned) batch.
    # Large batches: 256-row tiles (multiple of 256 -> full MXU M-passes on
    # v6e/v7x, multiple of 128 for v5e); keeps VMEM use well under the v5e
    # 16 MiB default scoped limit and gives grid >= 2 for megacore sharding.
    if batch <= 256:
        return _round_up(batch, 8)
    return 256


@jax.jit
def mlp_forward(x, prepped_params):
    """x: (batch, 555) float; prepped_params from prepare_params()."""
    w1, b1, w2, b2, w3, b3, w4, b4 = prepped_params
    batch = x.shape[0]
    batch_tile = _pick_batch_tile(batch)
    padded_batch = _round_up(batch, batch_tile)

    # Zero-pad rows (batch) to the tile and columns (555 -> 640), and cast to
    # bf16, once outside the kernel (XLA fuses pad + cast).  Every block the
    # kernel sees is then (8,128)-aligned and already in MXU input dtype.
    xp = jnp.pad(x.astype(jnp.float32),
                 ((0, padded_batch - batch), (0, D_IN_PAD - D_IN))
                 ).astype(jnp.bfloat16)

    grid = (padded_batch // batch_tile,)
    const_spec = lambda shape: pl.BlockSpec(shape, lambda i: (0, 0))

    out = pl.pallas_call(
        mlp_kernel,
        out_shape=jax.ShapeDtypeStruct((padded_batch, D_OUT), jnp.float32),
        grid_spec=pltpu.PrefetchScalarGridSpec(
            num_scalar_prefetch=0,
            grid=grid,
            in_specs=[
                pl.BlockSpec((batch_tile, D_IN_PAD), lambda i: (i, 0)),  # x tile (bf16)
                const_spec((D_IN_PAD, H_PAD)),  # W1 (bf16)
                const_spec((1, H_PAD)),         # b1 (f32)
                const_spec((H_PAD, H_PAD)),     # W2 (bf16)
                const_spec((1, H_PAD)),         # b2 (f32)
                const_spec((H_PAD, H_PAD)),     # W3 (bf16)
                const_spec((1, H_PAD)),         # b3 (f32)
                const_spec((1, H_PAD)),         # W4 as a row vector (bf16)
                const_spec((1, D_OUT)),         # b4 (f32)
            ],
            out_specs=pl.BlockSpec((batch_tile, D_OUT), lambda i: (i, 0)),
        ),
        compiler_params=pltpu.CompilerParams(
            dimension_semantics=("parallel",),
        ),
    )(xp, w1, b1, w2, b2, w3, b3, w4, b4)
    return out[:batch]


def init_linear(key, fan_in, fan_out):
    # Mimic torch.nn.Linear default init: U(-1/sqrt(fan_in), 1/sqrt(fan_in)).
    kw, kb = jax.random.split(key)
    bound = 1.0 / jnp.sqrt(jnp.float32(fan_in))
    w = jax.random.uniform(kw, (fan_in, fan_out), jnp.float32, -bound, bound)
    b = jax.random.uniform(kb, (1, fan_out), jnp.float32, -bound, bound)
    return w, b


def prepare_params(params):
    """Pad to lane-aligned shapes and cast weights to bf16 (done once, on host)."""
    w1, b1, w2, b2, w3, b3, w4, b4 = params
    w1p = jnp.pad(w1, ((0, D_IN_PAD - D_IN), (0, H_PAD - H))).astype(jnp.bfloat16)
    b1p = jnp.pad(b1, ((0, 0), (0, H_PAD - H)))                       # f32
    w2p = jnp.pad(w2, ((0, H_PAD - H), (0, H_PAD - H))).astype(jnp.bfloat16)
    b2p = jnp.pad(b2, ((0, 0), (0, H_PAD - H)))                       # f32
    w3p = jnp.pad(w3, ((0, H_PAD - H), (0, H_PAD - H))).astype(jnp.bfloat16)
    b3p = jnp.pad(b3, ((0, 0), (0, H_PAD - H)))                       # f32
    w4p = jnp.pad(w4.T, ((0, 0), (0, H_PAD - H))).astype(jnp.bfloat16)  # (1, 640)
    b4p = b4                                                           # (1, 1) f32
    return (w1p, b1p, w2p, b2p, w3p, b3p, w4p, b4p)


def reference_forward_f32(x, params):
    w1, b1, w2, b2, w3, b3, w4, b4 = params
    h = jnp.maximum(x @ w1 + b1, 0.0)
    h = jnp.maximum(h @ w2 + b2, 0.0)
    h = jnp.maximum(h @ w3 + b3, 0.0)
    return h @ w4 + b4


def reference_forward_bf16(x, prepped):
    # Same bf16-weight / f32-accumulation math as the kernel, in plain jnp.
    w1, b1, w2, b2, w3, b3, w4, b4 = prepped
    xp = jnp.pad(x, ((0, 0), (0, D_IN_PAD - D_IN))).astype(jnp.bfloat16)
    h = jnp.maximum(jnp.dot(xp, w1,
                            preferred_element_type=jnp.float32) + b1, 0.0)
    h = jnp.maximum(jnp.dot(h.astype(jnp.bfloat16), w2,
                            preferred_element_type=jnp.float32) + b2, 0.0)
    h = jnp.maximum(jnp.dot(h.astype(jnp.bfloat16), w3,
                            preferred_element_type=jnp.float32) + b3, 0.0)
    return jnp.sum(h * w4.astype(jnp.float32), axis=-1, keepdims=True) + b4


if __name__ == "__main__":
    key = jax.random.PRNGKey(0)
    k_x, k1, k2, k3, k4 = jax.random.split(key, 5)

    batch = 16
    x = jax.random.normal(k_x, (batch, D_IN), jnp.float32)

    w1, b1 = init_linear(k1, D_IN, H)
    w2, b2 = init_linear(k2, H, H)
    w3, b3 = init_linear(k3, H, H)
    w4, b4 = init_linear(k4, H, D_OUT)
    params = (w1, b1, w2, b2, w3, b3, w4, b4)
    prepped = prepare_params(params)

    out = mlp_forward(x, prepped)
    out = jax.block_until_ready(out)
    assert out.shape == (batch, D_OUT)

    # Tight check against a jnp reference using identical bf16 inputs/weights.
    ref_bf16 = reference_forward_bf16(x, prepped)
    assert jnp.allclose(out, ref_bf16, atol=2e-3, rtol=2e-3)

    # Loose check against the full-f32 reference (bf16 quantization error).
    ref_f32 = reference_forward_f32(x, params)
    assert jnp.allclose(out, ref_f32, atol=5e-2, rtol=5e-2)

    print("KERNEL_OK")
</pallas_src>

<mosaic_0001>
module attributes {stable_mosaic.version = 11 : i64} {
  func.func @mlp_kernel(%arg0: i32, %arg1: memref<16x640xbf16, #tpu.memory_space<vmem>>, %arg2: memref<640x640xbf16, #tpu.memory_space<vmem>>, %arg3: memref<1x640xf32, #tpu.memory_space<vmem>>, %arg4: memref<640x640xbf16, #tpu.memory_space<vmem>>, %arg5: memref<1x640xf32, #tpu.memory_space<vmem>>, %arg6: memref<640x640xbf16, #tpu.memory_space<vmem>>, %arg7: memref<1x640xf32, #tpu.memory_space<vmem>>, %arg8: memref<1x640xbf16, #tpu.memory_space<vmem>>, %arg9: memref<1x1xf32, #tpu.memory_space<vmem>>, %arg10: memref<16x1xf32, #tpu.memory_space<vmem>>) attributes {dimension_semantics = [#tpu.dimension_semantics<parallel>], iteration_bounds = array<i64: 1>, scalar_prefetch = 0 : i64, scratch_operands = 0 : i64, tpu.core_type = #tpu.core_type<tc>, window_params = [{transform_indices = @transform_0, window_bounds = array<i64: 16, 640>}, {pipeline_mode = #tpu.pipeline_mode<synchronous>, transform_indices = @transform_1, window_bounds = array<i64: 640, 640>}, {pipeline_mode = #tpu.pipeline_mode<synchronous>, transform_indices = @transform_2, window_bounds = array<i64: 1, 640>}, {pipeline_mode = #tpu.pipeline_mode<synchronous>, transform_indices = @transform_3, window_bounds = array<i64: 640, 640>}, {pipeline_mode = #tpu.pipeline_mode<synchronous>, transform_indices = @transform_4, window_bounds = array<i64: 1, 640>}, {pipeline_mode = #tpu.pipeline_mode<synchronous>, transform_indices = @transform_5, window_bounds = array<i64: 640, 640>}, {pipeline_mode = #tpu.pipeline_mode<synchronous>, transform_indices = @transform_6, window_bounds = array<i64: 1, 640>}, {pipeline_mode = #tpu.pipeline_mode<synchronous>, transform_indices = @transform_7, window_bounds = array<i64: 1, 640>}, {pipeline_mode = #tpu.pipeline_mode<synchronous>, transform_indices = @transform_8, window_bounds = array<i64: 1, 1>}, {transform_indices = @transform_9, window_bounds = array<i64: 16, 1>}]} {
    %c0 = arith.constant 0 : index
    %c0_0 = arith.constant 0 : index
    %0 = vector.load %arg1[%c0, %c0_0] : memref<16x640xbf16, #tpu.memory_space<vmem>>, vector<16x640xbf16>
    %c0_1 = arith.constant 0 : index
    %c0_2 = arith.constant 0 : index
    %1 = vector.load %arg2[%c0_1, %c0_2] : memref<640x640xbf16, #tpu.memory_space<vmem>>, vector<640x640xbf16>
    %cst = arith.constant dense<0.000000e+00> : vector<16x640xf32>
    %2 = tpu.matmul %0, %1, %cst {dimension_numbers = #tpu.dot_dimension_numbers<[1], [0], [0], [1], [0, 0, 1, 1], [], []>} : vector<16x640xbf16>, vector<640x640xbf16>, vector<16x640xf32> -> vector<16x640xf32>
    %c0_3 = arith.constant 0 : index
    %c0_4 = arith.constant 0 : index
    %3 = vector.load %arg3[%c0_3, %c0_4] : memref<1x640xf32, #tpu.memory_space<vmem>>, vector<1x640xf32>
    %4 = vector.broadcast %3 : vector<1x640xf32> to vector<16x640xf32>
    %5 = arith.addf %2, %4 : vector<16x640xf32>
    %cst_5 = arith.constant 0.000000e+00 : f32
    %6 = vector.broadcast %cst_5 : f32 to vector<16x640xf32>
    %7 = arith.maximumf %5, %6 : vector<16x640xf32>
    %8 = arith.truncf %7 : vector<16x640xf32> to vector<16x640xbf16>
    %c0_6 = arith.constant 0 : index
    %c0_7 = arith.constant 0 : index
    %9 = vector.load %arg4[%c0_6, %c0_7] : memref<640x640xbf16, #tpu.memory_space<vmem>>, vector<640x640xbf16>
    %cst_8 = arith.constant dense<0.000000e+00> : vector<16x640xf32>
    %10 = tpu.matmul %8, %9, %cst_8 {dimension_numbers = #tpu.dot_dimension_numbers<[1], [0], [0], [1], [0, 0, 1, 1], [], []>} : vector<16x640xbf16>, vector<640x640xbf16>, vector<16x640xf32> -> vector<16x640xf32>
    %c0_9 = arith.constant 0 : index
    %c0_10 = arith.constant 0 : index
    %11 = vector.load %arg5[%c0_9, %c0_10] : memref<1x640xf32, #tpu.memory_space<vmem>>, vector<1x640xf32>
    %12 = vector.broadcast %11 : vector<1x640xf32> to vector<16x640xf32>
    %13 = arith.addf %10, %12 : vector<16x640xf32>
    %cst_11 = arith.constant 0.000000e+00 : f32
    %14 = vector.broadcast %cst_11 : f32 to vector<16x640xf32>
    %15 = arith.maximumf %13, %14 : vector<16x640xf32>
    %16 = arith.truncf %15 : vector<16x640xf32> to vector<16x640xbf16>
    %c0_12 = arith.constant 0 : index
    %c0_13 = arith.constant 0 : index
    %17 = vector.load %arg6[%c0_12, %c0_13] : memref<640x640xbf16, #tpu.memory_space<vmem>>, vector<640x640xbf16>
    %cst_14 = arith.constant dense<0.000000e+00> : vector<16x640xf32>
    %18 = tpu.matmul %16, %17, %cst_14 {dimension_numbers = #tpu.dot_dimension_numbers<[1], [0], [0], [1], [0, 0, 1, 1], [], []>} : vector<16x640xbf16>, vector<640x640xbf16>, vector<16x640xf32> -> vector<16x640xf32>
    %c0_15 = arith.constant 0 : index
    %c0_16 = arith.constant 0 : index
    %19 = vector.load %arg7[%c0_15, %c0_16] : memref<1x640xf32, #tpu.memory_space<vmem>>, vector<1x640xf32>
    %20 = vector.broadcast %19 : vector<1x640xf32> to vector<16x640xf32>
    %21 = arith.addf %18, %20 : vector<16x640xf32>
    %cst_17 = arith.constant 0.000000e+00 : f32
    %22 = vector.broadcast %cst_17 : f32 to vector<16x640xf32>
    %23 = arith.maximumf %21, %22 : vector<16x640xf32>
    %c0_18 = arith.constant 0 : index
    %c0_19 = arith.constant 0 : index
    %24 = vector.load %arg8[%c0_18, %c0_19] : memref<1x640xbf16, #tpu.memory_space<vmem>>, vector<1x640xbf16>
    %25 = arith.extf %24 : vector<1x640xbf16> to vector<1x640xf32>
    %26 = vector.broadcast %25 : vector<1x640xf32> to vector<16x640xf32>
    %27 = arith.mulf %23, %26 : vector<16x640xf32>
    %cst_20 = arith.constant dense<0.000000e+00> : vector<16xf32>
    %28 = vector.multi_reduction <add>, %27, %cst_20 [1] : vector<16x640xf32> to vector<16xf32>
    %29 = vector.shape_cast %28 : vector<16xf32> to vector<16x1xf32>
    %c0_21 = arith.constant 0 : index
    %c0_22 = arith.constant 0 : index
    %30 = vector.load %arg9[%c0_21, %c0_22] : memref<1x1xf32, #tpu.memory_space<vmem>>, vector<1x1xf32>
    %31 = vector.broadcast %30 : vector<1x1xf32> to vector<16x1xf32>
    %32 = arith.addf %29, %31 : vector<16x1xf32>
    %c0_23 = arith.constant 0 : index
    %c0_24 = arith.constant 0 : index
    %33 = vector.load %arg10[%c0_23, %c0_24] : memref<16x1xf32, #tpu.memory_space<vmem>>, vector<16x1xf32>
    tpu.vector_store %arg10[%c0_23, %c0_24], %32 {strides = array<i32>} : memref<16x1xf32, #tpu.memory_space<vmem>>, vector<16x1xf32>,
    return
  }
  func.func @transform_0(%arg0: i32) -> (i32, i32) {
    %c0_i32 = arith.constant 0 : i32
    %c0_i32_0 = arith.constant 0 : i32
    return %arg0, %c0_i32 : i32, i32
  }
  func.func @transform_1(%arg0: i32) -> (i32, i32) {
    %c0_i32 = arith.constant 0 : i32
    %c0_i32_0 = arith.constant 0 : i32
    %c0_i32_1 = arith.constant 0 : i32
    return %c0_i32, %c0_i32_0 : i32, i32
  }
  func.func @transform_2(%arg0: i32) -> (i32, i32) {
    %c0_i32 = arith.constant 0 : i32
    %c0_i32_0 = arith.constant 0 : i32
    %c0_i32_1 = arith.constant 0 : i32
    return %c0_i32, %c0_i32_0 : i32, i32
  }
  func.func @transform_3(%arg0: i32) -> (i32, i32) {
    %c0_i32 = arith.constant 0 : i32
    %c0_i32_0 = arith.constant 0 : i32
    %c0_i32_1 = arith.constant 0 : i32
    return %c0_i32, %c0_i32_0 : i32, i32
  }
  func.func @transform_4(%arg0: i32) -> (i32, i32) {
    %c0_i32 = arith.constant 0 : i32
    %c0_i32_0 = arith.constant 0 : i32
    %c0_i32_1 = arith.constant 0 : i32
    return %c0_i32, %c0_i32_0 : i32, i32
  }
  func.func @transform_5(%arg0: i32) -> (i32, i32) {
    %c0_i32 = arith.constant 0 : i32
    %c0_i32_0 = arith.constant 0 : i32
    %c0_i32_1 = arith.constant 0 : i32
    return %c0_i32, %c0_i32_0 : i32, i32
  }
  func.func @transform_6(%arg0: i32) -> (i32, i32) {
    %c0_i32 = arith.constant 0 : i32
    %c0_i32_0 = arith.constant 0 : i32
    %c0_i32_1 = arith.constant 0 : i32
    return %c0_i32, %c0_i32_0 : i32, i32
  }
  func.func @transform_7(%arg0: i32) -> (i32, i32) {
    %c0_i32 = arith.constant 0 : i32
    %c0_i32_0 = arith.constant 0 : i32
    %c0_i32_1 = arith.constant 0 : i32
    return %c0_i32, %c0_i32_0 : i32, i32
  }
  func.func @transform_8(%arg0: i32) -> (i32, i32) {
    %c0_i32 = arith.constant 0 : i32
    %c0_i32_0 = arith.constant 0 : i32
    %c0_i32_1 = arith.constant 0 : i32
    return %c0_i32, %c0_i32_0 : i32, i32
  }
  func.func @transform_9(%arg0: i32) -> (i32, i32) {
    %c0_i32 = arith.constant 0 : i32
    %c0_i32_0 = arith.constant 0 : i32
    return %arg0, %c0_i32 : i32, i32
  }
}

</mosaic_0001>

<bundles_post_ra>
// kernel: mlp_forward.1
= control target key start
LH: loop header
LB: loop body
LE: loop exit
PB: predicated region body
PF: predicated region fallthrough
CT: control target
= control target key end

     0   :  { %s7441_s0 = inlined_call_operand.vmem [shape: bf16[16,640], index: 0, kind: input, shape index: {}]   ;;  %s7442_s1 = inlined_call_operand.hbm [shape: bf16[640,640], index: 1, kind: input, shape index: {}]   ;;  %s7443_s2 = inlined_call_operand.vmem [shape: f32[1,640], index: 2, kind: input, shape index: {}]   ;;  %s7444_s3 = inlined_call_operand.hbm [shape: bf16[640,640], index: 3, kind: input, shape index: {}]   ;;  %s7445_s4 = inlined_call_operand.vmem [shape: f32[1,640], index: 4, kind: input, shape index: {}]   ;;  %s7446_s5 = inlined_call_operand.hbm [shape: bf16[640,640], index: 5, kind: input, shape index: {}]   ;;  %s7447_s6 = inlined_call_operand.vmem [shape: f32[1,640], index: 6, kind: input, shape index: {}]   ;;  %s7448_s7 = inlined_call_operand.vmem [shape: bf16[1,640], index: 7, kind: input, shape index: {}]   ;;  %s7449_s8 = inlined_call_operand.<no memory space> [shape: f32[1,1], index: 8, kind: input, shape index: {}]   ;;  %s7450_s9 = inlined_call_operand.vmem [shape: f32[16,1], index: 9, kind: output, shape index: {}]  }
   0x1   :  { %v14_v0 = vstv %s7449_s8 }
   0x2   :  { %15 = vst [vmem:[#allocation2] sm:$0x1] %v14_v0 }
   0x3   :  { %16 = vsyncpa [#allocation4], 0 }
   0x4   :  { %17 = vsyncpa [#allocation6], 0  ;;  %s7124_s11 = smov [#allocation5]   ;;  %s7125_s13 = smov [#allocation3]  }
   0x5   :  { %s39_s12 = sshll.u32 %s7124_s11, 4  ;;  %s25_s14 = sshll.u32 %s7125_s13, 4  ;;  %s40_s12 = int_to_ptr.vmem [resolvable:$true] %s39_s12  ;;  %s7185_s14 = int_to_ptr.vmem [resolvable:$true] %s25_s14 }
   0x6   :  { %s7054_s17 = scalar_lea.hbm %s7444_s3, 25600 }
   0x7   :  { %p7055_p0 = scmp.ne.s32.totalorder %s7444_s3, %s7054_s17  ;;  %p7058_p1 = scmp.lt.u32.totalorder %s7054_s17, %s7444_s3 }
   0x9   :  { %p7060_p2 = pnand %p7058_p1, %p7055_p0 }
   0xb   :  { %7063 = shalt.err (!%p7060_p2)
}
   0xc   :  { %s7064_s21 = scalar_lea.vmem %s40_s12, 25600  ;;  %p7069_p4 = scmp.lt.s32.totalorder %s40_s12, %s40_s12 }
   0xd   :  { %p7065_p3 = scmp.ne.s32.totalorder %s40_s12, %s7064_s21  ;;  %p7070_p5 = scmp.lt.s32.totalorder %s7064_s21, %s7064_s21 }
   0xf   :  { %p7071_p6 = por %p7070_p5, %p7069_p4 }
  0x11   :  { %p7072_p7 = pnand %p7071_p6, %p7065_p3 }
  0x13   :  { %7075 = shalt.err (!%p7072_p7)
}
  0x14   :  { %s7126_s22 = smov 320   ;;  %s7127_s23 = smov 20  }
  0x15   :  { %45 = dma.hbm_to_vmem [thread:$0]  %s7444_s3, 25600, %s40_s12, [#allocation6], %s7126_s22, %s7126_s22, %s7127_s23  }
  0x16   :  { %s7076_s28 = scalar_lea.hbm %s7442_s1, 25600 }
  0x17   :  { %p7077_p8 = scmp.ne.s32.totalorder %s7442_s1, %s7076_s28  ;;  %p7080_p9 = scmp.lt.u32.totalorder %s7076_s28, %s7442_s1 }
  0x19   :  { %p7082_p10 = pnand %p7080_p9, %p7077_p8 }
  0x1b   :  { %7085 = shalt.err (!%p7082_p10)
}
  0x1c   :  { %s7086_s13 = scalar_lea.vmem %s7185_s14, 25600  ;;  %p7091_p12 = scmp.lt.s32.totalorder %s7185_s14, %s7185_s14 }
  0x1d   :  { %p7087_p11 = scmp.ne.s32.totalorder %s7185_s14, %s7086_s13  ;;  %p7092_p13 = scmp.lt.s32.totalorder %s7086_s13, %s7086_s13 }
  0x1f   :  { %p7093_p0 = por %p7092_p13, %p7091_p12 }
  0x21   :  { %p7094_p1 = pnand %p7093_p0, %p7087_p11 }
  0x23   :  { %7097 = shalt.err (!%p7094_p1)
}
  0x24   :  { %31 = dma.hbm_to_vmem [thread:$0]  %s7442_s1, 25600, %s7185_s14, [#allocation4], %s7126_s22, %s7126_s22, %s7127_s23  }
  0x25   :  { %s7128_s15 = smov [#allocation7]   ;;  %s7098_s19 = scalar_lea.hbm %s7446_s5, 25600 }
  0x26   :  { %s53_s16 = sshll.u32 %s7128_s15, 4  ;;  %p7099_p2 = scmp.ne.s32.totalorder %s7446_s5, %s7098_s19  ;;  %s54_s16 = int_to_ptr.vmem [resolvable:$true] %s53_s16 }
  0x27   :  { %p7102_p3 = scmp.lt.u32.totalorder %s7098_s19, %s7446_s5 }
  0x29   :  { %p7104_p4 = pnand %p7102_p3, %p7099_p2 }
  0x2b   :  { %7107 = shalt.err (!%p7104_p4)
}
  0x2c   :  { %s7108_s25 = scalar_lea.vmem %s54_s16, 25600  ;;  %p7113_p6 = scmp.lt.s32.totalorder %s54_s16, %s54_s16 }
  0x2d   :  { %p7109_p5 = scmp.ne.s32.totalorder %s54_s16, %s7108_s25  ;;  %p7114_p7 = scmp.lt.s32.totalorder %s7108_s25, %s7108_s25 }
  0x2f   :  { %p7115_p8 = por %p7114_p7, %p7113_p6 }
  0x31   :  { %p7116_p9 = pnand %p7115_p8, %p7109_p5 }
  0x33   :  { %7119 = shalt.err (!%p7116_p9)
}
  0x34   :  { %59 = dma.hbm_to_vmem [thread:$0]  %s7446_s5, 25600, %s54_s16, [#allocation6], %s7126_s22, %s7126_s22, %s7127_s23  }
  0x35   :  { %7120 = dma.done.wait [#allocation4], 25600  }
  0x36   :  { %7121 = vsyncadd [#allocation4], 4294941696 }
  0x37   :  { %7122 = dma.done.wait [#allocation6], 51200  }
  0x38   :  { %7123 = vsyncadd [#allocation6], 4294916096  ;;  %v6207_v1 = vld [vmem:[#allocation3 + $0x4] ss:$20 sps:$4 sm:$0xff]   ;;  %v6209_v2 = vld [vmem:[#allocation3 + $0xc] ss:$20 sps:$4 sm:$0xff]  }
  0x39   :  { %1415 = vmatprep.subr.bf16.mxu0 %v6207_v1  ;;  %v6211_v3 = vld [vmem:[#allocation3] ss:$20 sps:$4 sm:$0xff]   ;;  %v6212_v4 = vld [vmem:[#allocation3 + $0x8] ss:$20 sps:$4 sm:$0xff]   ;;  %1544 = vmatprep.subr.bf16.mxu1 %v6209_v2  ;;  %v6218_v8 = vld [vmem:[#allocation3 + $0x30] ss:$20 sps:$4 sm:$0xff]  }
  0x3a   :  { %v6213_v5 = vld [vmem:[#allocation3 + $0x2c] ss:$20 sps:$4 sm:$0xff]   ;;  %1416 = vmatpush1.bf16.msra.mxu0 %v6211_v3  ;;  %1545 = vmatpush1.bf16.msra.mxu1 %v6212_v4  ;;  %v6215_v6 = vld [vmem:[#allocation3 + $0x34] ss:$20 sps:$4 sm:$0xff]   ;;  %v6221_v10 = vld [vmem:[#allocation3 + $0x5c] ss:$20 sps:$4 sm:$0xff]  }
  0x3b   :  { %v6217_v7 = vld [vmem:[#allocation3 + $0x28] ss:$20 sps:$4 sm:$0xff]   ;;  %1417 = vmatprep.subr.bf16.mxu0 %v6213_v5  ;;  %1546 = vmatprep.subr.bf16.mxu1 %v6215_v6  ;;  %v6223_v11 = vld [vmem:[#allocation3 + $0x50] ss:$20 sps:$4 sm:$0xff]   ;;  %v6224_v12 = vld [vmem:[#allocation3 + $0x58] ss:$20 sps:$4 sm:$0xff]  }
  0x3c   :  { %v6219_v9 = vld [vmem:[#allocation3 + $0x54] ss:$20 sps:$4 sm:$0xff]   ;;  %v6225_v13 = vld [vmem:[#allocation3 + $0x7c] ss:$20 sps:$4 sm:$0xff]   ;;  %v6227_v14 = vld [vmem:[#allocation3 + $0x84] ss:$20 sps:$4 sm:$0xff]  }
  0x3d   :  { %v6229_v15 = vld [vmem:[#allocation3 + $0x78] ss:$20 sps:$4 sm:$0xff]   ;;  %v6230_v16 = vld [vmem:[#allocation3 + $0x80] ss:$20 sps:$4 sm:$0xff]   ;;  %v6236_v20 = vld [vmem:[#allocation3 + $0xa8] ss:$20 sps:$4 sm:$0xff]  }
  0x3e   :  { %1418 = vmatpush1.bf16.msra.mxu0 %v6217_v7  ;;  %1547 = vmatpush1.bf16.msra.mxu1 %v6218_v8  ;;  %v6231_v17 = vld [vmem:[#allocation3 + $0xa4] ss:$20 sps:$4 sm:$0xff]   ;;  %v6233_v18 = vld [vmem:[#allocation3 + $0xac] ss:$20 sps:$4 sm:$0xff]   ;;  %v6239_v22 = vld [vmem:[#allocation3 + $0xd4] ss:$20 sps:$4 sm:$0xff]  }
  0x3f   :  { %1419 = vmatprep.subr.bf16.mxu0 %v6219_v9  ;;  %1548 = vmatprep.subr.bf16.mxu1 %v6221_v10  ;;  %v6235_v19 = vld [vmem:[#allocation3 + $0xa0] ss:$20 sps:$4 sm:$0xff]   ;;  %v6241_v23 = vld [vmem:[#allocation3 + $0xc8] ss:$20 sps:$4 sm:$0xff]   ;;  %v6242_v24 = vld [vmem:[#allocation3 + $0xd0] ss:$20 sps:$4 sm:$0xff]  }
  0x40   :  { %v6237_v21 = vld [vmem:[#allocation3 + $0xcc] ss:$20 sps:$4 sm:$0xff]   ;;  %v6243_v25 = vld [vmem:[#allocation3 + $0xf4] ss:$20 sps:$4 sm:$0xff]   ;;  %v6245_v26 = vld [vmem:[#allocation3 + $0xfc] ss:$20 sps:$4 sm:$0xff]  }
  0x41   :  { %v6247_v27 = vld [vmem:[#allocation3 + $0xf0] ss:$20 sps:$4 sm:$0xff]   ;;  %v6248_v28 = vld [vmem:[#allocation3 + $0xf8] ss:$20 sps:$4 sm:$0xff]   ;;  %v6254_v32 = vld [vmem:[#allocation3 + $0x120] ss:$20 sps:$4 sm:$0xff]  }
  0x42   :  { %1420 = vmatpush1.bf16.msra.mxu0 %v6223_v11  ;;  %1549 = vmatpush1.bf16.msra.mxu1 %v6224_v12  ;;  %v6249_v29 = vld [vmem:[#allocation3 + $0x11c] ss:$20 sps:$4 sm:$0xff]   ;;  %v6251_v30 = vld [vmem:[#allocation3 + $0x124] ss:$20 sps:$4 sm:$0xff]   ;;  %v6257_v34 = vld [vmem:[#allocation3 + $0x14c] ss:$20 sps:$4 sm:$0xff]  }
  0x43   :  { %1421 = vmatprep.subr.bf16.mxu0 %v6225_v13  ;;  %1550 = vmatprep.subr.bf16.mxu1 %v6227_v14  ;;  %v6253_v31 = vld [vmem:[#allocation3 + $0x118] ss:$20 sps:$4 sm:$0xff]   ;;  %v6259_v35 = vld [vmem:[#allocation3 + $0x140] ss:$20 sps:$4 sm:$0xff]   ;;  %v6260_v36 = vld [vmem:[#allocation3 + $0x148] ss:$20 sps:$4 sm:$0xff]  }
  0x44   :  { %v6255_v33 = vld [vmem:[#allocation3 + $0x144] ss:$20 sps:$4 sm:$0xff]   ;;  %v6261_v37 = vld [vmem:[#allocation3 + $0x16c] ss:$20 sps:$4 sm:$0xff]   ;;  %v6263_v38 = vld [vmem:[#allocation3 + $0x174] ss:$20 sps:$4 sm:$0xff]  }
  0x45   :  { %v6265_v39 = vld [vmem:[#allocation3 + $0x168] ss:$20 sps:$4 sm:$0xff]   ;;  %v6266_v40 = vld [vmem:[#allocation3 + $0x170] ss:$20 sps:$4 sm:$0xff]   ;;  %v6272_v44 = vld [vmem:[#allocation3 + $0x198] ss:$20 sps:$4 sm:$0xff]  }
  0x46   :  { %1422 = vmatpush1.bf16.msra.mxu0 %v6229_v15  ;;  %1551 = vmatpush1.bf16.msra.mxu1 %v6230_v16  ;;  %v6267_v41 = vld [vmem:[#allocation3 + $0x194] ss:$20 sps:$4 sm:$0xff]   ;;  %v6269_v42 = vld [vmem:[#allocation3 + $0x19c] ss:$20 sps:$4 sm:$0xff]   ;;  %v6275_v46 = vld [vmem:[#allocation3 + $0x1c4] ss:$20 sps:$4 sm:$0xff]  }
  0x47   :  { %1423 = vmatprep.subr.bf16.mxu0 %v6231_v17  ;;  %1552 = vmatprep.subr.bf16.mxu1 %v6233_v18  ;;  %v6271_v43 = vld [vmem:[#allocation3 + $0x190] ss:$20 sps:$4 sm:$0xff]   ;;  %v6277_v47 = vld [vmem:[#allocation3 + $0x1b8] ss:$20 sps:$4 sm:$0xff]   ;;  %v6278_v49 = vld [vmem:[#allocation3 + $0x1c0] ss:$20 sps:$4 sm:$0xff]  }
  0x48   :  { %v6273_v45 = vld [vmem:[#allocation3 + $0x1bc] ss:$20 sps:$4 sm:$0xff]   ;;  %v7240_v48 = vld [vmem:[%s7441_s0 + $0x4] ss:$20 sps:$4 sm:$0xff]   ;;  %vm7131_vm0 = vmmov 0   ;;  %vm5293_vm1 = vcmask 7168  }
  0x49   :  { %v6279_v50 = vld [vmem:[#allocation3 + $0x1e4] ss:$20 sps:$4 sm:$0xff]   ;;  %v6281_v51 = vld [vmem:[#allocation3 + $0x1ec] ss:$20 sps:$4 sm:$0xff]   ;;  %1447 = vmatprep.mubr.bf16.mxu0 %v7240_v48  ;;  %1576 = vmatprep.mubr.bf16.mxu1 %v7240_v48  ;;  %v6284_v53 = vld [vmem:[#allocation3 + $0x1e8] ss:$20 sps:$4 sm:$0xff]  }
  0x4a   :  { %1424 = vmatpush1.bf16.msra.mxu0 %v6235_v19  ;;  %1553 = vmatpush1.bf16.msra.mxu1 %v6236_v20  ;;  %v6283_v52 = vld [vmem:[#allocation3 + $0x1e0] ss:$20 sps:$4 sm:$0xff]   ;;  %v6289_v56 = vld [vmem:[#allocation3 + $0x208] ss:$20 sps:$4 sm:$0xff]   ;;  %v6290_v57 = vld [vmem:[#allocation3 + $0x210] ss:$20 sps:$4 sm:$0xff]  }
  0x4b   :  { %1425 = vmatprep.subr.bf16.mxu0 %v6237_v21  ;;  %1554 = vmatprep.subr.bf16.mxu1 %v6239_v22  ;;  %v6285_v54 = vld [vmem:[#allocation3 + $0x20c] ss:$20 sps:$4 sm:$0xff]   ;;  %v6287_v55 = vld [vmem:[#allocation3 + $0x214] ss:$20 sps:$4 sm:$0xff]   ;;  %v6293_v59 = vld [vmem:[#allocation3 + $0x23c] ss:$20 sps:$4 sm:$0xff]  }
  0x4c   :  { %v6291_v58 = vld [vmem:[#allocation3 + $0x234] ss:$20 sps:$4 sm:$0xff]   ;;  %v6295_v60 = vld [vmem:[#allocation3 + $0x230] ss:$20 sps:$4 sm:$0xff]   ;;  %v6296_v61 = vld [vmem:[#allocation3 + $0x238] ss:$20 sps:$4 sm:$0xff]  }
  0x4d   :  { %v6297_v62 = vld [vmem:[#allocation3 + $0x25c] ss:$20 sps:$4 sm:$0xff]   ;;  %v6299_v63 = vld [vmem:[#allocation3 + $0x264] ss:$20 sps:$4 sm:$0xff]   ;;  %v6302_v1 = vld [vmem:[#allocation3 + $0x260] ss:$20 sps:$4 sm:$0xff]  }
  0x4e   :  { %1426 = vmatpush1.bf16.msra.mxu0 %v6241_v23  ;;  %1555 = vmatpush1.bf16.msra.mxu1 %v6242_v24  ;;  %v6301_v0 = vld [vmem:[#allocation3 + $0x258] ss:$20 sps:$4 sm:$0xff]   ;;  %v6305_v4 = vld [vmem:[#allocation3 + $0x280] ss:$20 sps:$4 sm:$0xff]   ;;  %v6308_v5 = vld [vmem:[#allocation3 + $0x288] ss:$20 sps:$4 sm:$0xff]  }
  0x4f   :  { %1427 = vmatprep.subr.bf16.mxu0 %v6243_v25  ;;  %1556 = vmatprep.subr.bf16.mxu1 %v6245_v26  ;;  %v6307_v2 = vld [vmem:[#allocation3 + $0x284] ss:$20 sps:$4 sm:$0xff]   ;;  %v6310_v3 = vld [vmem:[#allocation3 + $0x28c] ss:$20 sps:$4 sm:$0xff]   ;;  %v6317_v8 = vld [vmem:[#allocation3 + $0x2b4] ss:$20 sps:$4 sm:$0xff]  }
  0x50   :  { %v7247_v6 = vld [vmem:[%s7441_s0] ss:$20 sps:$4 sm:$0xff]   ;;  %v6321_v14 = vld [vmem:[#allocation3 + $0x2d8] ss:$20 sps:$4 sm:$0xff]  }
  0x51   :  { %v6314_v7 = vld [vmem:[#allocation3 + $0x2ac] ss:$20 sps:$4 sm:$0xff]   ;;  %v6312_v9 = vld [vmem:[#allocation3 + $0x2a8] ss:$20 sps:$4 sm:$0xff]   ;;  %v6315_v10 = vld [vmem:[#allocation3 + $0x2b0] ss:$20 sps:$4 sm:$0xff]  }
  0x52   :  { %1428 = vmatpush1.bf16.msra.mxu0 %v6247_v27  ;;  %1557 = vmatpush1.bf16.msra.mxu1 %v6248_v28  ;;  %v6320_v11 = vld [vmem:[#allocation3 + $0x2d4] ss:$20 sps:$4 sm:$0xff]   ;;  %v6323_v12 = vld [vmem:[#allocation3 + $0x2dc] ss:$20 sps:$4 sm:$0xff]   ;;  %v6329_v16 = vld [vmem:[#allocation3 + $0x304] ss:$20 sps:$4 sm:$0xff]  }
  0x53   :  { %1429 = vmatprep.subr.bf16.mxu0 %v6249_v29  ;;  %1558 = vmatprep.subr.bf16.mxu1 %v6251_v30  ;;  %v6318_v13 = vld [vmem:[#allocation3 + $0x2d0] ss:$20 sps:$4 sm:$0xff]   ;;  %v6324_v17 = vld [vmem:[#allocation3 + $0x2f8] ss:$20 sps:$4 sm:$0xff]   ;;  %v6327_v18 = vld [vmem:[#allocation3 + $0x300] ss:$20 sps:$4 sm:$0xff]  }
  0x54   :  { %v6326_v15 = vld [vmem:[#allocation3 + $0x2fc] ss:$20 sps:$4 sm:$0xff]   ;;  %v6332_v19 = vld [vmem:[#allocation3 + $0x324] ss:$20 sps:$4 sm:$0xff]   ;;  %v6335_v20 = vld [vmem:[#allocation3 + $0x32c] ss:$20 sps:$4 sm:$0xff]  }
  0x55   :  { %v6330_v21 = vld [vmem:[#allocation3 + $0x320] ss:$20 sps:$4 sm:$0xff]   ;;  %v6333_v22 = vld [vmem:[#allocation3 + $0x328] ss:$20 sps:$4 sm:$0xff]   ;;  %v6339_v26 = vld [vmem:[#allocation3 + $0x350] ss:$20 sps:$4 sm:$0xff]  }
  0x56   :  { %1430 = vmatpush1.bf16.msra.mxu0 %v6253_v31  ;;  %1559 = vmatpush1.bf16.msra.mxu1 %v6254_v32  ;;  %v6338_v23 = vld [vmem:[#allocation3 + $0x34c] ss:$20 sps:$4 sm:$0xff]   ;;  %v6341_v24 = vld [vmem:[#allocation3 + $0x354] ss:$20 sps:$4 sm:$0xff]   ;;  %v6347_v28 = vld [vmem:[#allocation3 + $0x37c] ss:$20 sps:$4 sm:$0xff]  }
  0x57   :  { %1431 = vmatprep.subr.bf16.mxu0 %v6255_v33  ;;  %1560 = vmatprep.subr.bf16.mxu1 %v6257_v34  ;;  %v6336_v25 = vld [vmem:[#allocation3 + $0x348] ss:$20 sps:$4 sm:$0xff]   ;;  %v6342_v29 = vld [vmem:[#allocation3 + $0x370] ss:$20 sps:$4 sm:$0xff]   ;;  %v6345_v30 = vld [vmem:[#allocation3 + $0x378] ss:$20 sps:$4 sm:$0xff]  }
  0x58   :  { %v6344_v27 = vld [vmem:[#allocation3 + $0x374] ss:$20 sps:$4 sm:$0xff]   ;;  %v6350_v32 = vld [vmem:[#allocation3 + $0x39c] ss:$20 sps:$4 sm:$0xff]   ;;  %v6353_v33 = vld [vmem:[#allocation3 + $0x3a4] ss:$20 sps:$4 sm:$0xff]  }
  0x59   :  { %v7254_v31 = vld [vmem:[%s7441_s0 + $0xc] ss:$20 sps:$4 sm:$0xff]  }
  0x5a   :  { %1432 = vmatpush1.bf16.msra.mxu0 %v6259_v35  ;;  %1561 = vmatpush1.bf16.msra.mxu1 %v6260_v36  ;;  %v6348_v34 = vld [vmem:[#allocation3 + $0x398] ss:$20 sps:$4 sm:$0xff]   ;;  %v6351_v35 = vld [vmem:[#allocation3 + $0x3a0] ss:$20 sps:$4 sm:$0xff]  }
  0x5b   :  { %1433 = vmatprep.subr.bf16.mxu0 %v6261_v37  ;;  %1562 = vmatprep.subr.bf16.mxu1 %v6263_v38  ;;  %v6356_v36 = vld [vmem:[#allocation3 + $0x3c4] ss:$20 sps:$4 sm:$0xff]   ;;  %v6359_v37 = vld [vmem:[#allocation3 + $0x3cc] ss:$20 sps:$4 sm:$0xff]  }
  0x5c   :  { %v6354_v38 = vld [vmem:[#allocation3 + $0x3c0] ss:$20 sps:$4 sm:$0xff]  }
  0x5e   :  { %1434 = vmatpush1.bf16.msra.mxu0 %v6265_v39  ;;  %1563 = vmatpush1.bf16.msra.mxu1 %v6266_v40  ;;  %v6357_v39 = vld [vmem:[#allocation3 + $0x3c8] ss:$20 sps:$4 sm:$0xff]   ;;  %v6362_v40 = vld [vmem:[#allocation3 + $0x3ec] ss:$20 sps:$4 sm:$0xff]  }
  0x5f   :  { %1435 = vmatprep.subr.bf16.mxu0 %v6267_v41  ;;  %1564 = vmatprep.subr.bf16.mxu1 %v6269_v42  ;;  %v6365_v41 = vld [vmem:[#allocation3 + $0x3f4] ss:$20 sps:$4 sm:$0xff]  }
  0x60   :  { %v6360_v42 = vld [vmem:[#allocation3 + $0x3e8] ss:$20 sps:$4 sm:$0xff]  }
  0x62   :  { %1436 = vmatpush1.bf16.msra.mxu0 %v6271_v43  ;;  %1565 = vmatpush1.bf16.msra.mxu1 %v6272_v44  ;;  %v6363_v43 = vld [vmem:[#allocation3 + $0x3f0] ss:$20 sps:$4 sm:$0xff]   ;;  %v6368_v44 = vld [vmem:[#allocation3 + $0x414] ss:$20 sps:$4 sm:$0xff]  }
  0x63   :  { %1437 = vmatprep.subr.bf16.mxu0 %v6273_v45  ;;  %1566 = vmatprep.subr.bf16.mxu1 %v6275_v46  ;;  %v6371_v45 = vld [vmem:[#allocation3 + $0x41c] ss:$20 sps:$4 sm:$0xff]  }
  0x64   :  { %v6366_v46 = vld [vmem:[#allocation3 + $0x410] ss:$20 sps:$4 sm:$0xff]  }
  0x66   :  { %1438 = vmatpush1.bf16.msra.mxu0 %v6277_v47  ;;  %1567 = vmatpush1.bf16.msra.mxu1 %v6278_v49  ;;  %v6369_v47 = vld [vmem:[#allocation3 + $0x418] ss:$20 sps:$4 sm:$0xff]   ;;  %v6374_v49 = vld [vmem:[#allocation3 + $0x43c] ss:$20 sps:$4 sm:$0xff]  }
  0x67   :  { %1439 = vmatprep.subr.bf16.mxu0 %v6279_v50  ;;  %1568 = vmatprep.subr.bf16.mxu1 %v6281_v51  ;;  %v6377_v50 = vld [vmem:[#allocation3 + $0x444] ss:$20 sps:$4 sm:$0xff]  }
  0x68   :  { %v6372_v51 = vld [vmem:[#allocation3 + $0x438] ss:$20 sps:$4 sm:$0xff]  }
  0x6a   :  { %1440 = vmatpush1.bf16.msra.mxu0 %v6283_v52  ;;  %1569 = vmatpush1.bf16.msra.mxu1 %v6284_v53  ;;  %v6375_v52 = vld [vmem:[#allocation3 + $0x440] ss:$20 sps:$4 sm:$0xff]   ;;  %v6380_v53 = vld [vmem:[#allocation3 + $0x464] ss:$20 sps:$4 sm:$0xff]  }
  0x6b   :  { %1441 = vmatprep.subr.bf16.mxu0 %v6285_v54  ;;  %1570 = vmatprep.subr.bf16.mxu1 %v6287_v55  ;;  %v6383_v54 = vld [vmem:[#allocation3 + $0x46c] ss:$20 sps:$4 sm:$0xff]  }
  0x6c   :  { %v6378_v55 = vld [vmem:[#allocation3 + $0x460] ss:$20 sps:$4 sm:$0xff]  }
  0x6e   :  { %1442 = vmatpush1.bf16.msra.mxu0 %v6289_v56  ;;  %1571 = vmatpush1.bf16.msra.mxu1 %v6290_v57  ;;  %v6381_v56 = vld [vmem:[#allocation3 + $0x468] ss:$20 sps:$4 sm:$0xff]   ;;  %v6386_v57 = vld [vmem:[#allocation3 + $0x48c] ss:$20 sps:$4 sm:$0xff]  }
  0x6f   :  { %1443 = vmatprep.subr.bf16.mxu0 %v6291_v58  ;;  %1572 = vmatprep.subr.bf16.mxu1 %v6293_v59  ;;  %v6389_v58 = vld [vmem:[#allocation3 + $0x494] ss:$20 sps:$4 sm:$0xff]  }
  0x70   :  { %v6384_v59 = vld [vmem:[#allocation3 + $0x488] ss:$20 sps:$4 sm:$0xff]  }
  0x72   :  { %1444 = vmatpush1.bf16.msra.mxu0 %v6295_v60  ;;  %1573 = vmatpush1.bf16.msra.mxu1 %v6296_v61  ;;  %v6387_v60 = vld [vmem:[#allocation3 + $0x490] ss:$20 sps:$4 sm:$0xff]   ;;  %v6392_v61 = vld [vmem:[#allocation3 + $0x4b4] ss:$20 sps:$4 sm:$0xff]  }
  0x73   :  { %1445 = vmatprep.subr.bf16.mxu0 %v6297_v62  ;;  %1574 = vmatprep.subr.bf16.mxu1 %v6299_v63  ;;  %v6395_v62 = vld [vmem:[#allocation3 + $0x4bc] ss:$20 sps:$4 sm:$0xff]  }
  0x74   :  { %v6390_v63 = vld [vmem:[#allocation3 + $0x4b0] ss:$20 sps:$4 sm:$0xff]  }
  0x76   :  { %1446 = vmatpush1.bf16.msra.mxu0 %v6301_v0  ;;  %1575 = vmatpush1.bf16.msra.mxu1 %v6302_v1  ;;  %v6393_v0 = vld [vmem:[#allocation3 + $0x4b8] ss:$20 sps:$4 sm:$0xff]   ;;  %v6398_v1 = vld [vmem:[#allocation3 + $0x4dc] ss:$20 sps:$4 sm:$0xff]  }
  0x77   :  { %1458 = vmatprep.subr.bf16.mxu0 %v6307_v2  ;;  %1587 = vmatprep.subr.bf16.mxu1 %v6310_v3  ;;  %v6401_v2 = vld [vmem:[#allocation3 + $0x4e4] ss:$20 sps:$4 sm:$0xff]  }
  0x78   :  { %v6396_v3 = vld [vmem:[#allocation3 + $0x4d8] ss:$20 sps:$4 sm:$0xff]  }
  0x79   :  { %1448 = vmatmul.mubr.bf16.vlgmr.msra.gmra.mrb[0].mxu0 %v7247_v6  ;;  %1577 = vmatmul.mubr.bf16.vlgmr.msra.gmra.mrb[0].mxu1 %v7247_v6 }
  0x7a   :  { %1459 = vmatpush1.bf16.msra.mxu0 %v6305_v4  ;;  %1588 = vmatpush1.bf16.msra.mxu1 %v6308_v5  ;;  %v6399_v4 = vld [vmem:[#allocation3 + $0x4e0] ss:$20 sps:$4 sm:$0xff]   ;;  %v6407_v5 = vld [vmem:[#allocation3 + $0x504] ss:$20 sps:$4 sm:$0xff]  }
  0x7b   :  { %1460 = vmatprep.subr.bf16.mxu0 %v6314_v7  ;;  %1589 = vmatprep.subr.bf16.mxu1 %v6317_v8  ;;  %v7261_v7 = vld [vmem:[%s7441_s0 + $0x8] ss:$20 sps:$4 sm:$0xff]   ;;  %v6410_v8 = vld [vmem:[#allocation3 + $0x50c] ss:$20 sps:$4 sm:$0xff]  }
  0x7c   :  { %1490 = vmatprep.mubr.bf16.mxu0 %v7254_v31  ;;  %1619 = vmatprep.mubr.bf16.mxu1 %v7254_v31 }
  0x7e   :  { %1461 = vmatpush1.bf16.msra.mxu0 %v6312_v9  ;;  %1590 = vmatpush1.bf16.msra.mxu1 %v6315_v10  ;;  %v6405_v9 = vld [vmem:[#allocation3 + $0x500] ss:$20 sps:$4 sm:$0xff]   ;;  %v6408_v10 = vld [vmem:[#allocation3 + $0x508] ss:$20 sps:$4 sm:$0xff]  }
  0x7f   :  { %1462 = vmatprep.subr.bf16.mxu0 %v6320_v11  ;;  %1591 = vmatprep.subr.bf16.mxu1 %v6323_v12  ;;  %v6413_v11 = vld [vmem:[#allocation3 + $0x52c] ss:$20 sps:$4 sm:$0xff]   ;;  %v6416_v12 = vld [vmem:[#allocation3 + $0x534] ss:$20 sps:$4 sm:$0xff]  }
  0x82   :  { %1463 = vmatpush1.bf16.msra.mxu0 %v6318_v13  ;;  %1592 = vmatpush1.bf16.msra.mxu1 %v6321_v14  ;;  %v6411_v13 = vld [vmem:[#allocation3 + $0x528] ss:$20 sps:$4 sm:$0xff]   ;;  %v6414_v14 = vld [vmem:[#allocation3 + $0x530] ss:$20 sps:$4 sm:$0xff]  }
  0x83   :  { %1464 = vmatprep.subr.bf16.mxu0 %v6326_v15  ;;  %1593 = vmatprep.subr.bf16.mxu1 %v6329_v16  ;;  %v6419_v15 = vld [vmem:[#allocation3 + $0x554] ss:$20 sps:$4 sm:$0xff]   ;;  %v6422_v16 = vld [vmem:[#allocation3 + $0x55c] ss:$20 sps:$4 sm:$0xff]  }
  0x86   :  { %1465 = vmatpush1.bf16.msra.mxu0 %v6324_v17  ;;  %1594 = vmatpush1.bf16.msra.mxu1 %v6327_v18  ;;  %v6417_v17 = vld [vmem:[#allocation3 + $0x550] ss:$20 sps:$4 sm:$0xff]   ;;  %v7129_v18 = vmov 0  }
  0x87   :  { %1466 = vmatprep.subr.bf16.mxu0 %v6332_v19  ;;  %1595 = vmatprep.subr.bf16.mxu1 %v6335_v20  ;;  %v6420_v19 = vld [vmem:[#allocation3 + $0x558] ss:$20 sps:$4 sm:$0xff]   ;;  %v6425_v20 = vld [vmem:[#allocation3 + $0x57c] ss:$20 sps:$4 sm:$0xff]  }
  0x8a   :  { %1467 = vmatpush1.bf16.msra.mxu0 %v6330_v21  ;;  %1596 = vmatpush1.bf16.msra.mxu1 %v6333_v22  ;;  %v6428_v21 = vld [vmem:[#allocation3 + $0x584] ss:$20 sps:$4 sm:$0xff]  }
  0x8b   :  { %1468 = vmatprep.subr.bf16.mxu0 %v6338_v23  ;;  %1597 = vmatprep.subr.bf16.mxu1 %v6341_v24  ;;  %v6423_v22 = vld [vmem:[#allocation3 + $0x578] ss:$20 sps:$4 sm:$0xff]   ;;  %v6426_v23 = vld [vmem:[#allocation3 + $0x580] ss:$20 sps:$4 sm:$0xff]  }
  0x8c   :  { %v6431_v24 = vld [vmem:[#allocation3 + $0x5a4] ss:$20 sps:$4 sm:$0xff]  }
  0x8e   :  { %1469 = vmatpush1.bf16.msra.mxu0 %v6336_v25  ;;  %1598 = vmatpush1.bf16.msra.mxu1 %v6339_v26  ;;  %v6434_v25 = vld [vmem:[#allocation3 + $0x5ac] ss:$20 sps:$4 sm:$0xff]  }
  0x8f   :  { %1470 = vmatprep.subr.bf16.mxu0 %v6344_v27  ;;  %1599 = vmatprep.subr.bf16.mxu1 %v6347_v28  ;;  %v6429_v26 = vld [vmem:[#allocation3 + $0x5a0] ss:$20 sps:$4 sm:$0xff]   ;;  %v6432_v27 = vld [vmem:[#allocation3 + $0x5a8] ss:$20 sps:$4 sm:$0xff]  }
  0x90   :  { %v6437_v28 = vld [vmem:[#allocation3 + $0x5cc] ss:$20 sps:$4 sm:$0xff]  }
  0x92   :  { %1471 = vmatpush1.bf16.msra.mxu0 %v6342_v29  ;;  %1600 = vmatpush1.bf16.msra.mxu1 %v6345_v30  ;;  %v6440_v29 = vld [vmem:[#allocation3 + $0x5d4] ss:$20 sps:$4 sm:$0xff]  }
  0x93   :  { %1472 = vmatprep.subr.bf16.mxu0 %v6350_v32  ;;  %1601 = vmatprep.subr.bf16.mxu1 %v6353_v33  ;;  %v6435_v30 = vld [vmem:[#allocation3 + $0x5c8] ss:$20 sps:$4 sm:$0xff]   ;;  %v6438_v32 = vld [vmem:[#allocation3 + $0x5d0] ss:$20 sps:$4 sm:$0xff]  }
  0x94   :  { %v6443_v33 = vld [vmem:[#allocation3 + $0x5f4] ss:$20 sps:$4 sm:$0xff]  }
  0x96   :  { %1473 = vmatpush1.bf16.msra.mxu0 %v6348_v34  ;;  %1602 = vmatpush1.bf16.msra.mxu1 %v6351_v35  ;;  %v6446_v34 = vld [vmem:[#allocation3 + $0x5fc] ss:$20 sps:$4 sm:$0xff]  }
  0x97   :  { %1474 = vmatprep.subr.bf16.mxu0 %v6356_v36  ;;  %1603 = vmatprep.subr.bf16.mxu1 %v6359_v37  ;;  %v6441_v35 = vld [vmem:[#allocation3 + $0x5f0] ss:$20 sps:$4 sm:$0xff]   ;;  %v6444_v36 = vld [vmem:[#allocation3 + $0x5f8] ss:$20 sps:$4 sm:$0xff]  }
  0x98   :  { %v6449_v37 = vld [vmem:[#allocation3 + $0x61c] ss:$20 sps:$4 sm:$0xff]  }
  0x9a   :  { %1475 = vmatpush1.bf16.msra.mxu0 %v6354_v38  ;;  %1604 = vmatpush1.bf16.msra.mxu1 %v6357_v39  ;;  %v6452_v38 = vld [vmem:[#allocation3 + $0x624] ss:$20 sps:$4 sm:$0xff]  }
  0x9b   :  { %1476 = vmatprep.subr.bf16.mxu0 %v6362_v40  ;;  %1605 = vmatprep.subr.bf16.mxu1 %v6365_v41  ;;  %v6447_v39 = vld [vmem:[#allocation3 + $0x618] ss:$20 sps:$4 sm:$0xff]   ;;  %v6450_v40 = vld [vmem:[#allocation3 + $0x620] ss:$20 sps:$4 sm:$0xff]   ;;  %v6454_v41 = vld [vmem:[#allocation3 + $0x150] ss:$20 sps:$4 sm:$0xff]  }
  0x9e   :  { %1477 = vmatpush1.bf16.msra.mxu0 %v6360_v42  ;;  %1606 = vmatpush1.bf16.msra.mxu1 %v6363_v43  ;;  %v6468_v42 = vld [vmem:[#allocation3 + $0x3d0] ss:$20 sps:$4 sm:$0xff]  }
  0x9f   :  { %1478 = vmatprep.subr.bf16.mxu0 %v6368_v44  ;;  %1607 = vmatprep.subr.bf16.mxu1 %v6371_v45  ;;  %v7270_v43 = vld [vmem:[%s7441_s0 + $0x10] ss:$20 sps:$4 sm:$0xff]  }
  0xa0   :  { %v6455_v44 = vld [vmem:[#allocation3 + $0x10] ss:$20 sps:$4 sm:$0xff]   ;;  %v6456_v45 = vld [vmem:[#allocation3 + $0x178] ss:$20 sps:$4 sm:$0xff]  }
  0xa2   :  { %1479 = vmatpush1.bf16.msra.mxu0 %v6366_v46  ;;  %1608 = vmatpush1.bf16.msra.mxu1 %v6369_v47  ;;  %v6470_v46 = vld [vmem:[#allocation3 + $0x290] ss:$20 sps:$4 sm:$0xff]   ;;  %v6472_v47 = vld [vmem:[#allocation3 + $0x3f8] ss:$20 sps:$4 sm:$0xff]  }
  0xa3   :  { %1480 = vmatprep.subr.bf16.mxu0 %v6374_v49  ;;  %1609 = vmatprep.subr.bf16.mxu1 %v6377_v50  ;;  %v6457_v49 = vld [vmem:[#allocation3 + $0x38] ss:$20 sps:$4 sm:$0xff]   ;;  %v6458_v50 = vld [vmem:[#allocation3 + $0x1a0] ss:$20 sps:$4 sm:$0xff]  }
  0xa6   :  { %1481 = vmatpush1.bf16.msra.mxu0 %v6372_v51  ;;  %1610 = vmatpush1.bf16.msra.mxu1 %v6375_v52  ;;  %v6473_v51 = vld [vmem:[#allocation3 + $0x2b8] ss:$20 sps:$4 sm:$0xff]   ;;  %v6475_v52 = vld [vmem:[#allocation3 + $0x420] ss:$20 sps:$4 sm:$0xff]  }
  0xa7   :  { %1482 = vmatprep.subr.bf16.mxu0 %v6380_v53  ;;  %1611 = vmatprep.subr.bf16.mxu1 %v6383_v54  ;;  %v6459_v53 = vld [vmem:[#allocation3 + $0x60] ss:$20 sps:$4 sm:$0xff]   ;;  %v6460_v54 = vld [vmem:[#allocation3 + $0x1c8] ss:$20 sps:$4 sm:$0xff]  }
  0xaa   :  { %1483 = vmatpush1.bf16.msra.mxu0 %v6378_v55  ;;  %1612 = vmatpush1.bf16.msra.mxu1 %v6381_v56  ;;  %v6476_v55 = vld [vmem:[#allocation3 + $0x2e0] ss:$20 sps:$4 sm:$0xff]   ;;  %v6478_v56 = vld [vmem:[#allocation3 + $0x448] ss:$20 sps:$4 sm:$0xff]  }
  0xab   :  { %1484 = vmatprep.subr.bf16.mxu0 %v6386_v57  ;;  %1613 = vmatprep.subr.bf16.mxu1 %v6389_v58  ;;  %v6461_v57 = vld [vmem:[#allocation3 + $0x88] ss:$20 sps:$4 sm:$0xff]   ;;  %v6462_v58 = vld [vmem:[#allocation3 + $0x1f0] ss:$20 sps:$4 sm:$0xff]  }
  0xae   :  { %1485 = vmatpush1.bf16.msra.mxu0 %v6384_v59  ;;  %1614 = vmatpush1.bf16.msra.mxu1 %v6387_v60  ;;  %v6479_v59 = vld [vmem:[#allocation3 + $0x308] ss:$20 sps:$4 sm:$0xff]   ;;  %v6481_v60 = vld [vmem:[#allocation3 + $0x470] ss:$20 sps:$4 sm:$0xff]  }
  0xaf   :  { %1486 = vmatprep.subr.bf16.mxu0 %v6392_v61  ;;  %1615 = vmatprep.subr.bf16.mxu1 %v6395_v62  ;;  %v6463_v61 = vld [vmem:[#allocation3 + $0xb0] ss:$20 sps:$4 sm:$0xff]   ;;  %v6484_v62 = vld [vmem:[#allocation3 + $0x498] ss:$20 sps:$4 sm:$0xff]  }
  0xb2   :  { %1487 = vmatpush1.bf16.msra.mxu0 %v6390_v63  ;;  %1616 = vmatpush1.bf16.msra.mxu1 %v6393_v0  ;;  %v6465_v63 = vld [vmem:[#allocation3 + $0xd8] ss:$20 sps:$4 sm:$0xff]   ;;  %v6466_v0 = vld [vmem:[#allocation3 + $0x240] ss:$20 sps:$4 sm:$0xff]  }
  0xb3   :  { %1488 = vmatprep.subr.bf16.mxu0 %v6398_v1  ;;  %1617 = vmatprep.subr.bf16.mxu1 %v6401_v2  ;;  %v6485_v1 = vld [vmem:[#allocation3 + $0x358] ss:$20 sps:$4 sm:$0xff]   ;;  %v6487_v2 = vld [vmem:[#allocation3 + $0x4c0] ss:$20 sps:$4 sm:$0xff]  }
  0xb6   :  { %1489 = vmatpush1.bf16.msra.mxu0 %v6396_v3  ;;  %1618 = vmatpush1.bf16.msra.mxu1 %v6399_v4  ;;  %v6467_v3 = vld [vmem:[#allocation3 + $0x100] ss:$20 sps:$4 sm:$0xff]   ;;  %v6469_v4 = vld [vmem:[#allocation3 + $0x268] ss:$20 sps:$4 sm:$0xff]  }
  0xb7   :  { %1501 = vmatprep.subr.bf16.mxu0 %v6407_v5  ;;  %1630 = vmatprep.subr.bf16.mxu1 %v6410_v8  ;;  %v6488_v5 = vld [vmem:[#allocation3 + $0x380] ss:$20 sps:$4 sm:$0xff]   ;;  %v6490_v8 = vld [vmem:[#allocation3 + $0x4e8] ss:$20 sps:$4 sm:$0xff]  }
  0xb9   :  { %1491 = vmatmul.mubr.bf16.vlgmr.msra.gmra.mrb[0].mxu0 %v7261_v7  ;;  %1620 = vmatmul.mubr.bf16.vlgmr.msra.gmra.mrb[0].mxu1 %v7261_v7 }
  0xba   :  { %1502 = vmatpush1.bf16.msra.mxu0 %v6405_v9  ;;  %1631 = vmatpush1.bf16.msra.mxu1 %v6408_v10  ;;  %v6471_v9 = vld [vmem:[#allocation3 + $0x128] ss:$20 sps:$4 sm:$0xff]  }
  0xbb   :  { %1503 = vmatprep.subr.bf16.mxu0 %v6413_v11  ;;  %1632 = vmatprep.subr.bf16.mxu1 %v6416_v12  ;;  %v6491_v10 = vld [vmem:[#allocation3 + $0x3a8] ss:$20 sps:$4 sm:$0xff]   ;;  %v6496_v11 = vld [vmem:[#allocation5 + $0x4] ss:$20 sps:$4 sm:$0xff]  }
  0xbc   :  { %1533 = vmatprep.mubr.bf16.mxu0 %v7129_v18  ;;  %1662 = vmatprep.mubr.bf16.mxu1 %v7129_v18  ;;  %v6474_v12 = vld [vmem:[#allocation3 + $0x510] ss:$20 sps:$4 sm:$0xff]  }
  0xbe   :  { %1504 = vmatpush1.bf16.msra.mxu0 %v6411_v13  ;;  %1633 = vmatpush1.bf16.msra.mxu1 %v6414_v14  ;;  %v6494_v13 = vld [vmem:[#allocation5] ss:$20 sps:$4 sm:$0xff]  }
  0xbf   :  { %1505 = vmatprep.subr.bf16.mxu0 %v6419_v15  ;;  %1634 = vmatprep.subr.bf16.mxu1 %v6422_v16  ;;  %v6502_v14 = vld [vmem:[#allocation5 + $0x2c] ss:$20 sps:$4 sm:$0xff]   ;;  %v7130_v15 = vmov 0.0  }
  0xc0   :  { %v6477_v16 = vld [vmem:[#allocation3 + $0x538] ss:$20 sps:$4 sm:$0xff]  }
  0xc2   :  { %1506 = vmatpush1.bf16.msra.mxu0 %v6417_v17  ;;  %1635 = vmatpush1.bf16.msra.mxu1 %v6420_v19  ;;  %v6500_v17 = vld [vmem:[#allocation5 + $0x28] ss:$20 sps:$4 sm:$0xff]  }
  0xc3   :  { %1507 = vmatprep.subr.bf16.mxu0 %v6425_v20  ;;  %1636 = vmatprep.subr.bf16.mxu1 %v6428_v21  ;;  %v6508_v19 = vld [vmem:[#allocation5 + $0x54] ss:$20 sps:$4 sm:$0xff]   ;;  %v6506_v21 = vld [vmem:[#allocation5 + $0x50] ss:$20 sps:$4 sm:$0xff]  }
  0xc4   :  { %v6480_v20 = vld [vmem:[#allocation3 + $0x560] ss:$20 sps:$4 sm:$0xff]  }
  0xc6   :  { %1508 = vmatpush1.bf16.msra.mxu0 %v6423_v22  ;;  %1637 = vmatpush1.bf16.msra.mxu1 %v6426_v23  ;;  %v6514_v22 = vld [vmem:[#allocation5 + $0x7c] ss:$20 sps:$4 sm:$0xff]   ;;  %v6520_v23 = vld [vmem:[#allocation5 + $0xa4] ss:$20 sps:$4 sm:$0xff]  }
  0xc7   :  { %1509 = vmatprep.subr.bf16.mxu0 %v6431_v24  ;;  %1638 = vmatprep.subr.bf16.mxu1 %v6434_v25  ;;  %v6486_v24 = vld [vmem:[#allocation3 + $0x5b0] ss:$20 sps:$4 sm:$0xff]   ;;  %v6518_v25 = vld [vmem:[#allocation5 + $0xa0] ss:$20 sps:$4 sm:$0xff]  }
  0xca   :  { %1510 = vmatpush1.bf16.msra.mxu0 %v6429_v26  ;;  %1639 = vmatpush1.bf16.msra.mxu1 %v6432_v27  ;;  %v6526_v26 = vld [vmem:[#allocation5 + $0xcc] ss:$20 sps:$4 sm:$0xff]  }
  0xcb   :  { %1511 = vmatprep.subr.bf16.mxu0 %v6437_v28  ;;  %1640 = vmatprep.subr.bf16.mxu1 %v6440_v29  ;;  %v6489_v27 = vld [vmem:[#allocation3 + $0x5d8] ss:$20 sps:$4 sm:$0xff]   ;;  %v6524_v28 = vld [vmem:[#allocation5 + $0xc8] ss:$20 sps:$4 sm:$0xff]  }
  0xcc   :  { %v6532_v29 = vld [vmem:[#allocation5 + $0xf4] ss:$20 sps:$4 sm:$0xff]  }
  0xce   :  { %1512 = vmatpush1.bf16.msra.mxu0 %v6435_v30  ;;  %1641 = vmatpush1.bf16.msra.mxu1 %v6438_v32  ;;  %v6492_v30 = vld [vmem:[#allocation3 + $0x600] ss:$20 sps:$4 sm:$0xff]   ;;  %v6530_v32 = vld [vmem:[#allocation5 + $0xf0] ss:$20 sps:$4 sm:$0xff]  }
  0xcf   :  { %1513 = vmatprep.subr.bf16.mxu0 %v6443_v33  ;;  %1642 = vmatprep.subr.bf16.mxu1 %v6446_v34  ;;  %v6538_v33 = vld [vmem:[#allocation5 + $0x11c] ss:$20 sps:$4 sm:$0xff]  }
  0xd0   :  { %v6493_v34 = vld [vmem:[#allocation3 + $0x628] ss:$20 sps:$4 sm:$0xff]  }
  0xd2   :  { %1514 = vmatpush1.bf16.msra.mxu0 %v6441_v35  ;;  %1643 = vmatpush1.bf16.msra.mxu1 %v6444_v36  ;;  %v6499_v35 = vld [vmem:[#allocation5 + $0xc] ss:$20 sps:$4 sm:$0xff]  }
  0xd3   :  { %1515 = vmatprep.subr.bf16.mxu0 %v6449_v37  ;;  %1644 = vmatprep.subr.bf16.mxu1 %v6452_v38  ;;  %v6536_v36 = vld [vmem:[#allocation5 + $0x118] ss:$20 sps:$4 sm:$0xff]   ;;  %v6497_v38 = vld [vmem:[#allocation5 + $0x8] ss:$20 sps:$4 sm:$0xff]  }
  0xd4   :  { %v6544_v37 = vld [vmem:[#allocation5 + $0x144] ss:$20 sps:$4 sm:$0xff]  }
  0xd6   :  { %1516 = vmatpush1.bf16.msra.mxu0 %v6447_v39  ;;  %1645 = vmatpush1.bf16.msra.mxu1 %v6450_v40  ;;  %v6505_v39 = vld [vmem:[#allocation5 + $0x34] ss:$20 sps:$4 sm:$0xff]  }
  0xd7   :  { %5908 = vmatprep.subr.bf16.mxu0 %v6454_v41  ;;  %5930 = vmatprep.subr.bf16.mxu1 %v6468_v42  ;;  %v6542_v40 = vld [vmem:[#allocation5 + $0x140] ss:$20 sps:$4 sm:$0xff]   ;;  %v6503_v42 = vld [vmem:[#allocation5 + $0x30] ss:$20 sps:$4 sm:$0xff]  }
  0xd8   :  { %v6550_v41 = vld [vmem:[#allocation5 + $0x16c] ss:$20 sps:$4 sm:$0xff]  }
  0xd9   :  { %1534 = vmatmul.mubr.bf16.vlgmr.msra.gmra.mrb[0].mxu0 %v7270_v43  ;;  %1663 = vmatmul.mubr.bf16.vlgmr.msra.gmra.mrb[0].mxu1 %v7270_v43 }
  0xda   :  { %5909 = vmatpush3.bf16.msra.mxu0 %v6455_v44  ;;  %5931 = vmatpush3.bf16.msra.mxu1 %v6470_v46  ;;  %v6511_v44 = vld [vmem:[#allocation5 + $0x5c] ss:$20 sps:$4 sm:$0xff]   ;;  %v6556_v46 = vld [vmem:[#allocation5 + $0x194] ss:$20 sps:$4 sm:$0xff]  }
  0xdb   :  { %5910 = vmatprep.subr.bf16.mxu0 %v6456_v45  ;;  %5932 = vmatprep.subr.bf16.mxu1 %v6472_v47  ;;  %v6548_v45 = vld [vmem:[#allocation5 + $0x168] ss:$20 sps:$4 sm:$0xff]   ;;  %v6509_v47 = vld [vmem:[#allocation5 + $0x58] ss:$20 sps:$4 sm:$0xff]  }
  0xdc   :  { %1705 = vmatprep.mubr.bf16.mxu0 %v7240_v48  ;;  %1746 = vmatprep.mubr.bf16.mxu1 %v7254_v31  ;;  %v6464_v48 = vld [vmem:[#allocation3 + $0x218] ss:$20 sps:$4 sm:$0xff]   ;;  %v6482_v31 = vld [vmem:[#allocation3 + $0x330] ss:$20 sps:$4 sm:$0xff]  }
  0xde   :  { %5911 = vmatpush3.bf16.msra.mxu0 %v6457_v49  ;;  %5933 = vmatpush3.bf16.msra.mxu1 %v6473_v51  ;;  %v6517_v49 = vld [vmem:[#allocation5 + $0x84] ss:$20 sps:$4 sm:$0xff]   ;;  %v6562_v51 = vld [vmem:[#allocation5 + $0x1bc] ss:$20 sps:$4 sm:$0xff]  }
  0xdf   :  { %5912 = vmatprep.subr.bf16.mxu0 %v6458_v50  ;;  %5934 = vmatprep.subr.bf16.mxu1 %v6475_v52  ;;  %v6554_v50 = vld [vmem:[#allocation5 + $0x190] ss:$20 sps:$4 sm:$0xff]   ;;  %v6515_v52 = vld [vmem:[#allocation5 + $0x80] ss:$20 sps:$4 sm:$0xff]  }
  0xe2   :  { %5913 = vmatpush3.bf16.msra.mxu0 %v6459_v53  ;;  %5935 = vmatpush3.bf16.msra.mxu1 %v6476_v55  ;;  %v6523_v53 = vld [vmem:[#allocation5 + $0xac] ss:$20 sps:$4 sm:$0xff]   ;;  %v6521_v55 = vld [vmem:[#allocation5 + $0xa8] ss:$20 sps:$4 sm:$0xff]  }
  0xe3   :  { %5914 = vmatprep.subr.bf16.mxu0 %v6460_v54  ;;  %5936 = vmatprep.subr.bf16.mxu1 %v6478_v56  ;;  %v6560_v54 = vld [vmem:[#allocation5 + $0x1b8] ss:$20 sps:$4 sm:$0xff]   ;;  %v6529_v56 = vld [vmem:[#allocation5 + $0xd4] ss:$20 sps:$4 sm:$0xff]  }
  0xe6   :  { %5915 = vmatpush3.bf16.msra.mxu0 %v6461_v57  ;;  %5937 = vmatpush3.bf16.msra.mxu1 %v6479_v59  ;;  %v6566_v57 = vld [vmem:[#allocation5 + $0x1e0] ss:$20 sps:$4 sm:$0xff]   ;;  %v6527_v59 = vld [vmem:[#allocation5 + $0xd0] ss:$20 sps:$4 sm:$0xff]  }
  0xe7   :  { %5916 = vmatprep.subr.bf16.mxu0 %v6462_v58  ;;  %5938 = vmatprep.subr.bf16.mxu1 %v6481_v60  ;;  %v6574_v58 = vld [vmem:[#allocation5 + $0x20c] ss:$20 sps:$4 sm:$0xff]   ;;  %v6535_v60 = vld [vmem:[#allocation5 + $0xfc] ss:$20 sps:$4 sm:$0xff]  }
  0xea   :  { %5917 = vmatpush3.bf16.msra.mxu0 %v6463_v61  ;;  %5939 = vmatpush3.bf16.msra.mxu1 %v6482_v31  ;;  %v6572_v61 = vld [vmem:[#allocation5 + $0x208] ss:$20 sps:$4 sm:$0xff]  }
  0xeb   :  { %5918 = vmatprep.subr.bf16.mxu0 %v6464_v48  ;;  %5940 = vmatprep.subr.bf16.mxu1 %v6484_v62  ;;  %v6533_v48 = vld [vmem:[#allocation5 + $0xf8] ss:$20 sps:$4 sm:$0xff]   ;;  %v6580_v31 = vld [vmem:[#allocation5 + $0x234] ss:$20 sps:$4 sm:$0xff]  }
  0xec   :  { %v6541_v62 = vld [vmem:[#allocation5 + $0x124] ss:$20 sps:$4 sm:$0xff]  }
  0xee   :  { %5919 = vmatpush3.bf16.msra.mxu0 %v6465_v63  ;;  %5941 = vmatpush3.bf16.msra.mxu1 %v6485_v1  ;;  %v6578_v63 = vld [vmem:[#allocation5 + $0x230] ss:$20 sps:$4 sm:$0xff]  }
  0xef   :  { %5920 = vmatprep.subr.bf16.mxu0 %v6466_v0  ;;  %5942 = vmatprep.subr.bf16.mxu1 %v6487_v2  ;;  %v6539_v0 = vld [vmem:[#allocation5 + $0x120] ss:$20 sps:$4 sm:$0xff]   ;;  %v6586_v1 = vld [vmem:[#allocation5 + $0x25c] ss:$20 sps:$4 sm:$0xff]  }
  0xf0   :  { %v6547_v2 = vld [vmem:[#allocation5 + $0x14c] ss:$20 sps:$4 sm:$0xff]  }
  0xf2   :  { %5921 = vmatpush3.bf16.msra.mxu0 %v6467_v3  ;;  %5943 = vmatpush3.bf16.msra.mxu1 %v6488_v5  ;;  %v6584_v3 = vld [vmem:[#allocation5 + $0x258] ss:$20 sps:$4 sm:$0xff]   ;;  %v6545_v5 = vld [vmem:[#allocation5 + $0x148] ss:$20 sps:$4 sm:$0xff]  }
  0xf3   :  { %5922 = vmatprep.subr.bf16.mxu0 %v6469_v4  ;;  %5944 = vmatprep.subr.bf16.mxu1 %v6490_v8  ;;  %v6592_v4 = vld [vmem:[#allocation5 + $0x284] ss:$20 sps:$4 sm:$0xff]   ;;  %v6553_v8 = vld [vmem:[#allocation5 + $0x174] ss:$20 sps:$4 sm:$0xff]  }
  0xf6   :  { %5923 = vmatpush3.bf16.msra.mxu0 %v6471_v9  ;;  %5945 = vmatpush3.bf16.msra.mxu1 %v6491_v10  ;;  %v6551_v9 = vld [vmem:[#allocation5 + $0x170] ss:$20 sps:$4 sm:$0xff]  }
  0xf7   :  { %6067 = vmatprep.subr.bf16.mxu0 %v7130_v15  ;;  %3118 = vmatprep.subr.bf16.mxu1 %v6496_v11  ;;  %v6559_v10 = vld [vmem:[#allocation5 + $0x19c] ss:$20 sps:$4 sm:$0xff]   ;;  %v6557_v11 = vld [vmem:[#allocation5 + $0x198] ss:$20 sps:$4 sm:$0xff]  }
  0xf9   :  { %1706 = vmatmul.mubr.bf16.vlgmr.msra.gmra.mrb[4].mxu0 %v7247_v6  ;;  %1747 = vmatmul.mubr.bf16.vlgmr.msra.gmra.mrb[4].mxu1 %v7261_v7  ;;  %v6483_v6 = vld [vmem:[#allocation3 + $0x588] ss:$20 sps:$4 sm:$0xff]   ;;  %v6512_v7 = vld [vmem:[#allocation5 + $0x78] ss:$20 sps:$4 sm:$0xff]  }
  0xfa   :  { %6068 = vmatpush3.bf16.msra.mxu0 %v6474_v12  ;;  %6083 = vmatprep.mubr.msk.bf16.mxu0 %vm7131_vm0, %v7130_v15  ;;  %v6565_v12 = vld [vmem:[#allocation5 + $0x1c4] ss:$20 sps:$4 sm:$0xff]  }
  0xfb   :  { %6069 = vmatprep.subr.bf16.mxu0 %v7130_v15  ;;  %3119 = vmatpush1.bf16.msra.mxu1 %v6494_v13  ;;  %v6563_v13 = vld [vmem:[#allocation5 + $0x1c0] ss:$20 sps:$4 sm:$0xff]  }
  0xfc   :  { %3120 = vmatprep.subr.bf16.mxu1 %v6502_v14  ;;  %v6571_v14 = vld [vmem:[#allocation5 + $0x1ec] ss:$20 sps:$4 sm:$0xff]  }
  0xfe   :  { %6070 = vmatpush3.bf16.msra.mxu0 %v6477_v16  ;;  %v6569_v16 = vld [vmem:[#allocation5 + $0x1e8] ss:$20 sps:$4 sm:$0xff]  }
  0xff   :  { %6071 = vmatprep.subr.bf16.mxu0 %v7130_v15  ;;  %3121 = vmatpush1.bf16.msra.mxu1 %v6500_v17  ;;  %v6577_v17 = vld [vmem:[#allocation5 + $0x214] ss:$20 sps:$4 sm:$0xff]  }
 0x100   :  { %3122 = vmatprep.subr.bf16.mxu1 %v6508_v19  ;;  %v6575_v19 = vld [vmem:[#allocation5 + $0x210] ss:$20 sps:$4 sm:$0xff]  }
 0x102   :  { %6072 = vmatpush3.bf16.msra.mxu0 %v6480_v20  ;;  %v6583_v20 = vld [vmem:[#allocation5 + $0x23c] ss:$20 sps:$4 sm:$0xff]  }
 0x103   :  { %6073 = vmatprep.subr.bf16.mxu0 %v7130_v15  ;;  %3123 = vmatpush1.bf16.msra.mxu1 %v6506_v21  ;;  %v6581_v21 = vld [vmem:[#allocation5 + $0x238] ss:$20 sps:$4 sm:$0xff]  }
 0x104   :  { %3124 = vmatprep.subr.bf16.mxu1 %v6514_v22  ;;  %v6589_v22 = vld [vmem:[#allocation5 + $0x264] ss:$20 sps:$4 sm:$0xff]  }
 0x106   :  { %6074 = vmatpush3.bf16.msra.mxu0 %v6483_v6  ;;  %v6587_v6 = vld [vmem:[#allocation5 + $0x260] ss:$20 sps:$4 sm:$0xff]  }
 0x107   :  { %6075 = vmatprep.subr.bf16.mxu0 %v7130_v15  ;;  %3125 = vmatpush1.bf16.msra.mxu1 %v6512_v7  ;;  %v6595_v7 = vld [vmem:[#allocation5 + $0x28c] ss:$20 sps:$4 sm:$0xff]  }
 0x108   :  { %3126 = vmatprep.subr.bf16.mxu1 %v6520_v23  ;;  %v324_v23 = vlaneseq }
 0x10a   :  { %6076 = vmatpush3.bf16.msra.mxu0 %v6486_v24  ;;  %v7289_v24 = vshrl.u32 %v324_v23, 7  ;;  %v6628_v23 = vld [vmem:[#allocation5 + $0x374] ss:$20 sps:$4 sm:$0xff]  }
 0x10b   :  { %6077 = vmatprep.subr.bf16.mxu0 %v7130_v15  ;;  %3127 = vmatpush1.bf16.msra.mxu1 %v6518_v25  ;;  %v7294_v25 = vld [vmem:[%s7443_s2] sm:$0x1f] }
 0x10c   :  { %3128 = vmatprep.subr.bf16.mxu1 %v6526_v26  ;;  %v7297_v26 = vsub.s32 0, %v7289_v24 }
 0x10e   :  { %6078 = vmatpush3.bf16.msra.mxu0 %v6489_v27  ;;  %v7300_v27 = vsub.s32 2, %v7289_v24 }
 0x10f   :  { %6079 = vmatprep.subr.bf16.mxu0 %v7130_v15  ;;  %3129 = vmatpush1.bf16.msra.mxu1 %v6524_v28  ;;  %v7303_v28 = vsub.s32 1, %v7289_v24 }
 0x110   :  { %3130 = vmatprep.subr.bf16.mxu1 %v6532_v29  ;;  %v7306_v29 = vsub.s32 3, %v7289_v24 }
 0x112   :  { %6080 = vmatpush3.bf16.msra.mxu0 %v6492_v30  ;;  %v327_v30 = vrot.slane %v7294_v25, %v7297_v26 }
 0x113   :  { %6081 = vmatprep.subr.bf16.mxu0 %v7130_v15  ;;  %3131 = vmatpush1.bf16.msra.mxu1 %v6530_v32  ;;  %v335_v32 = vrot.slane %v7294_v25, %v7300_v27 }
 0x114   :  { %3132 = vmatprep.subr.bf16.mxu1 %v6538_v33  ;;  %v331_v33 = vrot.slane %v7294_v25, %v7303_v28 }
 0x116   :  { %6082 = vmatpush3.bf16.msra.mxu0 %v6493_v34  ;;  %v339_v34 = vrot.slane %v7294_v25, %v7306_v29 }
 0x117   :  { %3247 = vmatprep.subr.bf16.mxu0 %v6499_v35  ;;  %3133 = vmatpush1.bf16.msra.mxu1 %v6536_v36 }
 0x118   :  { %3134 = vmatprep.subr.bf16.mxu1 %v6544_v37 }
 0x119   :  { %6084 = vmatmul.mubr.bf16.vlgmr.msra.gmra.mrb[8].mxu0 %v7270_v43  ;;  %v6568_v43 = vld [vmem:[#allocation5 + $0x1e4] ss:$20 sps:$4 sm:$0xff]  }
 0x11a   :  { %3248 = vmatpush1.bf16.msra.mxu0 %v6497_v38 }
 0x11b   :  { %3249 = vmatprep.subr.bf16.mxu0 %v6505_v39  ;;  %3135 = vmatpush1.bf16.msra.mxu1 %v6542_v40 }
 0x11c   :  { %3136 = vmatprep.subr.bf16.mxu1 %v6550_v41 }
 0x11e   :  { %3250 = vmatpush1.bf16.msra.mxu0 %v6503_v42 }
 0x11f   :  { %3251 = vmatprep.subr.bf16.mxu0 %v6511_v44  ;;  %3137 = vmatpush1.bf16.msra.mxu1 %v6548_v45 }
 0x120   :  { %3138 = vmatprep.subr.bf16.mxu1 %v6556_v46 }
 0x122   :  { %3252 = vmatpush1.bf16.msra.mxu0 %v6509_v47 }
 0x123   :  { %3253 = vmatprep.subr.bf16.mxu0 %v6517_v49  ;;  %3139 = vmatpush1.bf16.msra.mxu1 %v6554_v50 }
 0x124   :  { %3140 = vmatprep.subr.bf16.mxu1 %v6562_v51 }
 0x126   :  { %3254 = vmatpush1.bf16.msra.mxu0 %v6515_v52 }
 0x127   :  { %3255 = vmatprep.subr.bf16.mxu0 %v6523_v53  ;;  %3141 = vmatpush1.bf16.msra.mxu1 %v6560_v54 }
 0x128   :  { %3142 = vmatprep.subr.bf16.mxu1 %v6568_v43 }
 0x12a   :  { %3256 = vmatpush1.bf16.msra.mxu0 %v6521_v55 }
 0x12b   :  { %3257 = vmatprep.subr.bf16.mxu0 %v6529_v56  ;;  %3143 = vmatpush1.bf16.msra.mxu1 %v6566_v57 }
 0x12c   :  { %3144 = vmatprep.subr.bf16.mxu1 %v6574_v58 }
 0x12e   :  { %3258 = vmatpush1.bf16.msra.mxu0 %v6527_v59 }
 0x12f   :  { %3259 = vmatprep.subr.bf16.mxu0 %v6535_v60  ;;  %3145 = vmatpush1.bf16.msra.mxu1 %v6572_v61 }
 0x130   :  { %3146 = vmatprep.subr.bf16.mxu1 %v6580_v31 }
 0x132   :  { %3260 = vmatpush1.bf16.msra.mxu0 %v6533_v48 }
 0x133   :  { %3261 = vmatprep.subr.bf16.mxu0 %v6541_v62  ;;  %3147 = vmatpush1.bf16.msra.mxu1 %v6578_v63  ;;  %v6590_v62 = vld [vmem:[#allocation5 + $0x280] ss:$20 sps:$4 sm:$0xff]   ;;  %v6593_v63 = vld [vmem:[#allocation5 + $0x288] ss:$20 sps:$4 sm:$0xff]  }
 0x134   :  { %3148 = vmatprep.subr.bf16.mxu1 %v6586_v1  ;;  %v6601_v1 = vld [vmem:[#allocation5 + $0x2b4] ss:$20 sps:$4 sm:$0xff]  }
 0x136   :  { %3262 = vmatpush1.bf16.msra.mxu0 %v6539_v0  ;;  %v6598_v0 = vld [vmem:[#allocation5 + $0x2ac] ss:$20 sps:$4 sm:$0xff]  }
 0x137   :  { %3263 = vmatprep.subr.bf16.mxu0 %v6547_v2  ;;  %3149 = vmatpush1.bf16.msra.mxu1 %v6584_v3  ;;  %v6596_v2 = vld [vmem:[#allocation5 + $0x2a8] ss:$20 sps:$4 sm:$0xff]   ;;  %v6599_v3 = vld [vmem:[#allocation5 + $0x2b0] ss:$20 sps:$4 sm:$0xff]  }
 0x138   :  { %3161 = vmatprep.subr.bf16.mxu1 %v6592_v4  ;;  %v6604_v4 = vld [vmem:[#allocation5 + $0x2d4] ss:$20 sps:$4 sm:$0xff]  }
 0x13a   :  { %3264 = vmatpush1.bf16.msra.mxu0 %v6545_v5  ;;  %v6607_v5 = vld [vmem:[#allocation5 + $0x2dc] ss:$20 sps:$4 sm:$0xff]  }
 0x13b   :  { %3265 = vmatprep.subr.bf16.mxu0 %v6553_v8  ;;  %v6602_v8 = vld [vmem:[#allocation5 + $0x2d0] ss:$20 sps:$4 sm:$0xff]  }
 0x13e   :  { %3266 = vmatpush1.bf16.msra.mxu0 %v6551_v9  ;;  %v6605_v9 = vld [vmem:[#allocation5 + $0x2d8] ss:$20 sps:$4 sm:$0xff]  }
 0x13f   :  { %3267 = vmatprep.subr.bf16.mxu0 %v6559_v10  ;;  %v6610_v10 = vld [vmem:[#allocation5 + $0x2fc] ss:$20 sps:$4 sm:$0xff]  }
 0x142   :  { %3268 = vmatpush1.bf16.msra.mxu0 %v6557_v11  ;;  %v6613_v11 = vld [vmem:[#allocation5 + $0x304] ss:$20 sps:$4 sm:$0xff]  }
 0x143   :  { %3269 = vmatprep.subr.bf16.mxu0 %v6565_v12  ;;  %v6608_v12 = vld [vmem:[#allocation5 + $0x2f8] ss:$20 sps:$4 sm:$0xff]  }
 0x146   :  { %3270 = vmatpush1.bf16.msra.mxu0 %v6563_v13  ;;  %v6611_v13 = vld [vmem:[#allocation5 + $0x300] ss:$20 sps:$4 sm:$0xff]  }
 0x147   :  { %3271 = vmatprep.subr.bf16.mxu0 %v6571_v14  ;;  %v6616_v14 = vld [vmem:[#allocation5 + $0x324] ss:$20 sps:$4 sm:$0xff]  }
 0x14a   :  { %3272 = vmatpush1.bf16.msra.mxu0 %v6569_v16  ;;  %v6619_v16 = vld [vmem:[#allocation5 + $0x32c] ss:$20 sps:$4 sm:$0xff]  }
 0x14b   :  { %3273 = vmatprep.subr.bf16.mxu0 %v6577_v17  ;;  %v6614_v17 = vld [vmem:[#allocation5 + $0x320] ss:$20 sps:$4 sm:$0xff]  }
 0x14e   :  { %3274 = vmatpush1.bf16.msra.mxu0 %v6575_v19  ;;  %v6617_v19 = vld [vmem:[#allocation5 + $0x328] ss:$20 sps:$4 sm:$0xff]  }
 0x14f   :  { %3275 = vmatprep.subr.bf16.mxu0 %v6583_v20  ;;  %v6622_v20 = vld [vmem:[#allocation5 + $0x34c] ss:$20 sps:$4 sm:$0xff]  }
 0x152   :  { %3276 = vmatpush1.bf16.msra.mxu0 %v6581_v21  ;;  %v6625_v21 = vld [vmem:[#allocation5 + $0x354] ss:$20 sps:$4 sm:$0xff]  }
 0x153   :  { %3277 = vmatprep.subr.bf16.mxu0 %v6589_v22  ;;  %v6620_v22 = vld [vmem:[#allocation5 + $0x348] ss:$20 sps:$4 sm:$0xff]  }
 0x156   :  { %3278 = vmatpush1.bf16.msra.mxu0 %v6587_v6  ;;  %v6623_v6 = vld [vmem:[#allocation5 + $0x350] ss:$20 sps:$4 sm:$0xff]  }
 0x157   :  { %3290 = vmatprep.subr.bf16.mxu0 %v6595_v7  ;;  %v7331_v7 = vsub.s32 4, %v7289_v24 }
 0x1ac   :  { %v1535_v35 = vpop.f32.mrb[0].mxu0  ;;  %v1664_v36 = vpop.f32.mrb[0].mxu1 }
 0x1ad   :  { %v6127_v37 = vadd.f32 %v1535_v35, %v327_v30  ;;  %v6131_v38 = vadd.f32 %v1664_v36, %v335_v32  ;;  %v1537_v39 = vpop.f32.mrb[1].mxu0  ;;  %v1666_v40 = vpop.f32.mrb[1].mxu1  ;;  %v343_v35 = vrot.slane %v7294_v25, %v7331_v7 }
 0x1ae   :  { %v6128_v41 = vadd.f32 %v1537_v39, %v331_v33  ;;  %v6132_v42 = vadd.f32 %v1666_v40, %v339_v34  ;;  %v1539_v44 = vpop.f32.mrb[2].mxu0  ;;  %v1668_v45 = vpop.f32.mrb[2].mxu1 }
 0x1af   :  { %v6129_v46 = vadd.f32 %v1539_v44, %v327_v30  ;;  %v6133_v47 = vadd.f32 %v1668_v45, %v335_v32  ;;  %v1541_v49 = vpop.f32.mrb[3].mxu0  ;;  %v1670_v50 = vpop.f32.mrb[3].mxu1  ;;  %v1796_v53 = vmax.f32 %v6127_v37, 0.0  ;;  %v1798_v54 = vmax.f32 %v6131_v38, 0.0  ;;  %v6631_v30 = vld [vmem:[#allocation5 + $0x37c] ss:$20 sps:$4 sm:$0xff]  }
 0x1b0   :  { %v6130_v51 = vadd.f32 %v1541_v49, %v331_v33  ;;  %v6134_v52 = vadd.f32 %v1670_v50, %v339_v34  ;;  %v1797_v56 = vmax.f32 %v6128_v41, 0.0  ;;  %v1799_v57 = vmax.f32 %v6132_v42, 0.0  ;;  %v6626_v32 = vld [vmem:[#allocation5 + $0x370] ss:$20 sps:$4 sm:$0xff]   ;;  %v6629_v33 = vld [vmem:[#allocation5 + $0x378] ss:$20 sps:$4 sm:$0xff]  }
 0x1b1   :  { %v1801_v43 = vmax.f32 %v6129_v46, 0.0  ;;  %v1803_v55 = vmax.f32 %v6133_v47, 0.0  ;;  %v6634_v37 = vld [vmem:[#allocation5 + $0x39c] ss:$20 sps:$4 sm:$0xff]   ;;  %v6637_v38 = vld [vmem:[#allocation5 + $0x3a4] ss:$20 sps:$4 sm:$0xff]  }
 0x1b2   :  { %v1802_v58 = vmax.f32 %v6130_v51, 0.0  ;;  %v1804_v59 = vmax.f32 %v6134_v52, 0.0  ;;  %v6632_v49 = vld [vmem:[#allocation5 + $0x398] ss:$20 sps:$4 sm:$0xff]   ;;  %v6635_v50 = vld [vmem:[#allocation5 + $0x3a0] ss:$20 sps:$4 sm:$0xff]  }
 0x1b3   :  { %v7316_v60 = vpack.c.bf16 %v1801_v43, %v1796_v53  ;;  %v7318_v61 = vpack.c.bf16 %v1803_v55, %v1798_v54  ;;  %v6640_v53 = vld [vmem:[#allocation5 + $0x3c4] ss:$20 sps:$4 sm:$0xff]   ;;  %v6643_v54 = vld [vmem:[#allocation5 + $0x3cc] ss:$20 sps:$4 sm:$0xff]  }
 0x1b4   :  { %v7320_v48 = vpack.c.bf16 %v1802_v58, %v1797_v56  ;;  %v7322_v31 = vpack.c.bf16 %v1804_v59, %v1799_v57  ;;  %v6638_v56 = vld [vmem:[#allocation5 + $0x3c0] ss:$20 sps:$4 sm:$0xff]   ;;  %v6641_v57 = vld [vmem:[#allocation5 + $0x3c8] ss:$20 sps:$4 sm:$0xff]  }
 0x1b5   :  { %v6646_v59 = vld [vmem:[#allocation5 + $0x3ec] ss:$20 sps:$4 sm:$0xff]  }
 0x1b6   :  { %3150 = vmatprep.mubr.bf16.mxu1 %v7320_v48  ;;  %3279 = vmatprep.mubr.bf16.mxu0 %v7320_v48 }
 0x1b7   :  { %3151 = vmatmul.mubr.bf16.vlgmr.msra.gmra.mrb[8].mxu1 %v7316_v60  ;;  %3280 = vmatmul.mubr.bf16.vlgmr.msra.gmra.mrb[12].mxu0 %v7316_v60 }
 0x1b8   :  { %3162 = vmatpush1.bf16.msra.mxu1 %v6590_v62  ;;  %3291 = vmatpush1.bf16.msra.mxu0 %v6593_v63  ;;  %v6649_v62 = vld [vmem:[#allocation5 + $0x3f4] ss:$20 sps:$4 sm:$0xff]  }
 0x1b9   :  { %3193 = vmatprep.mubr.bf16.mxu1 %v7322_v31  ;;  %3322 = vmatprep.mubr.bf16.mxu0 %v7322_v31  ;;  %v6644_v63 = vld [vmem:[#allocation5 + $0x3e8] ss:$20 sps:$4 sm:$0xff]  }
 0x1ba   :  { %3163 = vmatprep.subr.bf16.mxu1 %v6598_v0  ;;  %3292 = vmatprep.subr.bf16.mxu0 %v6601_v1  ;;  %v6647_v0 = vld [vmem:[#allocation5 + $0x3f0] ss:$20 sps:$4 sm:$0xff]   ;;  %v6652_v1 = vld [vmem:[#allocation5 + $0x414] ss:$20 sps:$4 sm:$0xff]  }
 0x1bc   :  { %3164 = vmatpush1.bf16.msra.mxu1 %v6596_v2  ;;  %3293 = vmatpush1.bf16.msra.mxu0 %v6599_v3  ;;  %v6655_v2 = vld [vmem:[#allocation5 + $0x41c] ss:$20 sps:$4 sm:$0xff]  }
 0x1bd   :  { %3165 = vmatprep.subr.bf16.mxu1 %v6604_v4  ;;  %3294 = vmatprep.subr.bf16.mxu0 %v6607_v5  ;;  %v6650_v3 = vld [vmem:[#allocation5 + $0x410] ss:$20 sps:$4 sm:$0xff]   ;;  %v6653_v4 = vld [vmem:[#allocation5 + $0x418] ss:$20 sps:$4 sm:$0xff]  }
 0x1be   :  { %v6658_v5 = vld [vmem:[#allocation5 + $0x43c] ss:$20 sps:$4 sm:$0xff]  }
 0x1c0   :  { %3166 = vmatpush1.bf16.msra.mxu1 %v6602_v8  ;;  %3295 = vmatpush1.bf16.msra.mxu0 %v6605_v9  ;;  %v6661_v8 = vld [vmem:[#allocation5 + $0x444] ss:$20 sps:$4 sm:$0xff]  }
 0x1c1   :  { %3167 = vmatprep.subr.bf16.mxu1 %v6610_v10  ;;  %3296 = vmatprep.subr.bf16.mxu0 %v6613_v11  ;;  %v6656_v9 = vld [vmem:[#allocation5 + $0x438] ss:$20 sps:$4 sm:$0xff]   ;;  %v6659_v10 = vld [vmem:[#allocation5 + $0x440] ss:$20 sps:$4 sm:$0xff]  }
 0x1c2   :  { %v6664_v11 = vld [vmem:[#allocation5 + $0x464] ss:$20 sps:$4 sm:$0xff]  }
 0x1c4   :  { %3168 = vmatpush1.bf16.msra.mxu1 %v6608_v12  ;;  %3297 = vmatpush1.bf16.msra.mxu0 %v6611_v13  ;;  %v6667_v12 = vld [vmem:[#allocation5 + $0x46c] ss:$20 sps:$4 sm:$0xff]  }
 0x1c5   :  { %3169 = vmatprep.subr.bf16.mxu1 %v6616_v14  ;;  %3298 = vmatprep.subr.bf16.mxu0 %v6619_v16  ;;  %v6662_v13 = vld [vmem:[#allocation5 + $0x460] ss:$20 sps:$4 sm:$0xff]   ;;  %v6665_v14 = vld [vmem:[#allocation5 + $0x468] ss:$20 sps:$4 sm:$0xff]  }
 0x1c6   :  { %v6670_v16 = vld [vmem:[#allocation5 + $0x48c] ss:$20 sps:$4 sm:$0xff]  }
 0x1c8   :  { %3170 = vmatpush1.bf16.msra.mxu1 %v6614_v17  ;;  %3299 = vmatpush1.bf16.msra.mxu0 %v6617_v19  ;;  %v6673_v17 = vld [vmem:[#allocation5 + $0x494] ss:$20 sps:$4 sm:$0xff]  }
 0x1c9   :  { %3171 = vmatprep.subr.bf16.mxu1 %v6622_v20  ;;  %3300 = vmatprep.subr.bf16.mxu0 %v6625_v21  ;;  %v6668_v19 = vld [vmem:[#allocation5 + $0x488] ss:$20 sps:$4 sm:$0xff]   ;;  %v6671_v20 = vld [vmem:[#allocation5 + $0x490] ss:$20 sps:$4 sm:$0xff]  }
 0x1ca   :  { %v6676_v21 = vld [vmem:[#allocation5 + $0x4b4] ss:$20 sps:$4 sm:$0xff]  }
 0x1cc   :  { %3172 = vmatpush1.bf16.msra.mxu1 %v6620_v22  ;;  %3301 = vmatpush1.bf16.msra.mxu0 %v6623_v6  ;;  %v5924_v34 = vpop.f32.mrb[4].mxu0  ;;  %v5946_v36 = vpop.f32.mrb[4].mxu1  ;;  %v6679_v22 = vld [vmem:[#allocation5 + $0x4bc] ss:$20 sps:$4 sm:$0xff]  }
 0x1cd   :  { %3173 = vmatprep.subr.bf16.mxu1 %v6628_v23  ;;  %3302 = vmatprep.subr.bf16.mxu0 %v6631_v30  ;;  %v5925_v39 = vpop.f32.mrb[5].mxu0  ;;  %v5947_v40 = vpop.f32.mrb[5].mxu1  ;;  %v6674_v6 = vld [vmem:[#allocation5 + $0x4b0] ss:$20 sps:$4 sm:$0xff]   ;;  %v6677_v23 = vld [vmem:[#allocation5 + $0x4b8] ss:$20 sps:$4 sm:$0xff]  }
 0x1ce   :  { %v5926_v41 = vadd.f32 %v5925_v39, %v5924_v34  ;;  %v5927_v42 = vpop.f32.mrb[6].mxu0  ;;  %v5948_v44 = vadd.f32 %v5947_v40, %v5946_v36  ;;  %v5949_v45 = vpop.f32.mrb[6].mxu1  ;;  %v6685_v34 = vld [vmem:[#allocation5 + $0x4e4] ss:$20 sps:$4 sm:$0xff]  }
 0x1cf   :  { %v5928_v46 = vpop.f32.mrb[7].mxu0  ;;  %v5950_v47 = vpop.f32.mrb[7].mxu1  ;;  %v6680_v40 = vld [vmem:[#allocation5 + $0x4d8] ss:$20 sps:$4 sm:$0xff]  }
 0x1d0   :  { %3174 = vmatpush1.bf16.msra.mxu1 %v6626_v32  ;;  %3303 = vmatpush1.bf16.msra.mxu0 %v6629_v33  ;;  %v1708_v51 = vadd.f32 %v5926_v41, %v343_v35  ;;  %v5929_v52 = vadd.f32 %v5928_v46, %v5927_v42  ;;  %v5951_v25 = vadd.f32 %v5950_v47, %v5949_v45  ;;  %v6682_v33 = vld [vmem:[#allocation5 + $0x4dc] ss:$20 sps:$4 sm:$0xff]   ;;  %v6683_v41 = vld [vmem:[#allocation5 + $0x4e0] ss:$20 sps:$4 sm:$0xff]  }
 0x1d1   :  { %3175 = vmatprep.subr.bf16.mxu1 %v6634_v37  ;;  %3304 = vmatprep.subr.bf16.mxu0 %v6637_v38  ;;  %v6691_v45 = vld [vmem:[#allocation5 + $0x50c] ss:$20 sps:$4 sm:$0xff]  }
 0x1d2   :  { %v1711_v43 = vadd.f32 %v5929_v52, %v343_v35  ;;  %v1749_v55 = vadd.f32 %v5948_v44, %v1708_v51  ;;  %v6688_v44 = vld [vmem:[#allocation5 + $0x504] ss:$20 sps:$4 sm:$0xff]   ;;  %v6686_v47 = vld [vmem:[#allocation5 + $0x500] ss:$20 sps:$4 sm:$0xff]   ;;  %v6692_v52 = vld [vmem:[#allocation5 + $0x528] ss:$20 sps:$4 sm:$0xff]  }
 0x1d3   :  { %v6697_v51 = vld [vmem:[#allocation5 + $0x534] ss:$20 sps:$4 sm:$0xff]  }
 0x1d4   :  { %3176 = vmatpush1.bf16.msra.mxu1 %v6632_v49  ;;  %3305 = vmatpush1.bf16.msra.mxu0 %v6635_v50  ;;  %v1752_v58 = vadd.f32 %v5951_v25, %v1711_v43  ;;  %v6689_v49 = vld [vmem:[#allocation5 + $0x508] ss:$20 sps:$4 sm:$0xff]   ;;  %v6694_v50 = vld [vmem:[#allocation5 + $0x52c] ss:$20 sps:$4 sm:$0xff]   ;;  %v6695_v25 = vld [vmem:[#allocation5 + $0x530] ss:$20 sps:$4 sm:$0xff]  }
 0x1d5   :  { %3177 = vmatprep.subr.bf16.mxu1 %v6640_v53  ;;  %3306 = vmatprep.subr.bf16.mxu0 %v6643_v54  ;;  %v6700_v53 = vld [vmem:[#allocation5 + $0x554] ss:$20 sps:$4 sm:$0xff]   ;;  %v6703_v54 = vld [vmem:[#allocation5 + $0x55c] ss:$20 sps:$4 sm:$0xff]  }
 0x1d6   :  { %v6698_v43 = vld [vmem:[#allocation5 + $0x550] ss:$20 sps:$4 sm:$0xff]  }
 0x1d8   :  { %3178 = vmatpush1.bf16.msra.mxu1 %v6638_v56  ;;  %3307 = vmatpush1.bf16.msra.mxu0 %v6641_v57  ;;  %v6706_v56 = vld [vmem:[#allocation5 + $0x57c] ss:$20 sps:$4 sm:$0xff]   ;;  %v6709_v57 = vld [vmem:[#allocation5 + $0x584] ss:$20 sps:$4 sm:$0xff]  }
 0x1d9   :  { %3179 = vmatprep.subr.bf16.mxu1 %v6646_v59  ;;  %3308 = vmatprep.subr.bf16.mxu0 %v6649_v62  ;;  %v6707_v59 = vld [vmem:[#allocation5 + $0x580] ss:$20 sps:$4 sm:$0xff]   ;;  %v6712_v62 = vld [vmem:[#allocation5 + $0x5a4] ss:$20 sps:$4 sm:$0xff]  }
 0x1dc   :  { %3180 = vmatpush1.bf16.msra.mxu1 %v6644_v63  ;;  %3309 = vmatpush1.bf16.msra.mxu0 %v6647_v0  ;;  %v6715_v63 = vld [vmem:[#allocation5 + $0x5ac] ss:$20 sps:$4 sm:$0xff]  }
 0x1dd   :  { %3181 = vmatprep.subr.bf16.mxu1 %v6652_v1  ;;  %3310 = vmatprep.subr.bf16.mxu0 %v6655_v2  ;;  %v6710_v0 = vld [vmem:[#allocation5 + $0x5a0] ss:$20 sps:$4 sm:$0xff]   ;;  %v6713_v1 = vld [vmem:[#allocation5 + $0x5a8] ss:$20 sps:$4 sm:$0xff]  }
 0x1de   :  { %v6718_v2 = vld [vmem:[#allocation5 + $0x5cc] ss:$20 sps:$4 sm:$0xff]  }
 0x1e0   :  { %3182 = vmatpush1.bf16.msra.mxu1 %v6650_v3  ;;  %3311 = vmatpush1.bf16.msra.mxu0 %v6653_v4  ;;  %v6721_v3 = vld [vmem:[#allocation5 + $0x5d4] ss:$20 sps:$4 sm:$0xff]  }
 0x1e1   :  { %3183 = vmatprep.subr.bf16.mxu1 %v6658_v5  ;;  %3312 = vmatprep.subr.bf16.mxu0 %v6661_v8  ;;  %v6716_v4 = vld [vmem:[#allocation5 + $0x5c8] ss:$20 sps:$4 sm:$0xff]   ;;  %v6719_v5 = vld [vmem:[#allocation5 + $0x5d0] ss:$20 sps:$4 sm:$0xff]  }
 0x1e2   :  { %v6724_v8 = vld [vmem:[#allocation5 + $0x5f4] ss:$20 sps:$4 sm:$0xff]  }
 0x1e4   :  { %3184 = vmatpush1.bf16.msra.mxu1 %v6656_v9  ;;  %3313 = vmatpush1.bf16.msra.mxu0 %v6659_v10  ;;  %v6727_v9 = vld [vmem:[#allocation5 + $0x5fc] ss:$20 sps:$4 sm:$0xff]  }
 0x1e5   :  { %3185 = vmatprep.subr.bf16.mxu1 %v6664_v11  ;;  %3314 = vmatprep.subr.bf16.mxu0 %v6667_v12  ;;  %v6722_v10 = vld [vmem:[#allocation5 + $0x5f0] ss:$20 sps:$4 sm:$0xff]   ;;  %v6725_v11 = vld [vmem:[#allocation5 + $0x5f8] ss:$20 sps:$4 sm:$0xff]  }
 0x1e6   :  { %v6730_v12 = vld [vmem:[#allocation5 + $0x61c] ss:$20 sps:$4 sm:$0xff]  }
 0x1e8   :  { %3186 = vmatpush1.bf16.msra.mxu1 %v6662_v13  ;;  %3315 = vmatpush1.bf16.msra.mxu0 %v6665_v14  ;;  %v6733_v13 = vld [vmem:[#allocation5 + $0x624] ss:$20 sps:$4 sm:$0xff]  }
 0x1e9   :  { %3187 = vmatprep.subr.bf16.mxu1 %v6670_v16  ;;  %3316 = vmatprep.subr.bf16.mxu0 %v6673_v17  ;;  %v6728_v14 = vld [vmem:[#allocation5 + $0x618] ss:$20 sps:$4 sm:$0xff]   ;;  %v6731_v16 = vld [vmem:[#allocation5 + $0x620] ss:$20 sps:$4 sm:$0xff]   ;;  %v6734_v17 = vld [vmem:[#allocation5 + $0x150] ss:$20 sps:$4 sm:$0xff]  }
 0x1ec   :  { %3188 = vmatpush1.bf16.msra.mxu1 %v6668_v19  ;;  %3317 = vmatpush1.bf16.msra.mxu0 %v6671_v20  ;;  %v1789_v30 = vpop.f32.mrb[8].mxu0  ;;  %v6735_v19 = vld [vmem:[#allocation5 + $0x3d0] ss:$20 sps:$4 sm:$0xff]  }
 0x1ed   :  { %3189 = vmatprep.subr.bf16.mxu1 %v6676_v21  ;;  %3318 = vmatprep.subr.bf16.mxu0 %v6679_v22  ;;  %v1790_v32 = vadd.f32 %v1789_v30, %v1749_v55  ;;  %v6085_v35 = vpop.f32.mrb[9].mxu0  ;;  %v6701_v55 = vld [vmem:[#allocation5 + $0x558] ss:$20 sps:$4 sm:$0xff]   ;;  %v6736_v20 = vld [vmem:[#allocation5 + $0x10] ss:$20 sps:$4 sm:$0xff]  }
 0x1ee   :  { %v1792_v36 = vpop.f32.mrb[10].mxu0  ;;  %v6737_v21 = vld [vmem:[#allocation5 + $0x290] ss:$20 sps:$4 sm:$0xff]   ;;  %v6738_v22 = vld [vmem:[#allocation5 + $0x178] ss:$20 sps:$4 sm:$0xff]  }
 0x1ef   :  { %v1800_v37 = vmax.f32 %v1790_v32, 0.0  ;;  %v1793_v38 = vadd.f32 %v1792_v36, %v1752_v58  ;;  %v6086_v39 = vpop.f32.mrb[11].mxu0  ;;  %v6704_v58 = vld [vmem:[#allocation5 + $0x578] ss:$20 sps:$4 sm:$0xff]   ;;  %v6742_v32 = vld [vmem:[#allocation5 + $0x1a0] ss:$20 sps:$4 sm:$0xff]  }
 0x1f0   :  { %3190 = vmatpush1.bf16.msra.mxu1 %v6674_v6  ;;  %3319 = vmatpush1.bf16.msra.mxu0 %v6677_v23  ;;  %v6739_v6 = vld [vmem:[#allocation5 + $0x3f8] ss:$20 sps:$4 sm:$0xff]   ;;  %v6745_v35 = vld [vmem:[#allocation5 + $0x2e0] ss:$20 sps:$4 sm:$0xff]   ;;  %v6746_v36 = vld [vmem:[#allocation5 + $0x1c8] ss:$20 sps:$4 sm:$0xff]  }
 0x1f1   :  { %3191 = vmatprep.subr.bf16.mxu1 %v6682_v33  ;;  %3320 = vmatprep.subr.bf16.mxu0 %v6685_v34  ;;  %v1805_v42 = vmax.f32 %v1793_v38, 0.0  ;;  %v6740_v23 = vld [vmem:[#allocation5 + $0x38] ss:$20 sps:$4 sm:$0xff]   ;;  %v6743_v33 = vld [vmem:[#allocation5 + $0x420] ss:$20 sps:$4 sm:$0xff]  }
 0x1f2   :  { %v6741_v30 = vld [vmem:[#allocation5 + $0x2b8] ss:$20 sps:$4 sm:$0xff]   ;;  %v6744_v34 = vld [vmem:[#allocation5 + $0x60] ss:$20 sps:$4 sm:$0xff]   ;;  %v6748_v38 = vld [vmem:[#allocation5 + $0x88] ss:$20 sps:$4 sm:$0xff]  }
 0x1f3   :  { %v7335_v46 = vpack.c.bf16 %v1805_v42, %v1800_v37  ;;  %v6747_v37 = vld [vmem:[#allocation5 + $0x448] ss:$20 sps:$4 sm:$0xff]   ;;  %v6750_v39 = vld [vmem:[#allocation5 + $0x1f0] ss:$20 sps:$4 sm:$0xff]   ;;  %v6754_v42 = vld [vmem:[#allocation5 + $0x218] ss:$20 sps:$4 sm:$0xff]  }
 0x1f4   :  { %3192 = vmatpush1.bf16.msra.mxu1 %v6680_v40  ;;  %3321 = vmatpush1.bf16.msra.mxu0 %v6683_v41  ;;  %v6752_v40 = vld [vmem:[#allocation5 + $0xb0] ss:$20 sps:$4 sm:$0xff]  }
 0x1f5   :  { %3204 = vmatprep.subr.bf16.mxu1 %v6688_v44  ;;  %3333 = vmatprep.subr.bf16.mxu0 %v6691_v45  ;;  %v6753_v41 = vld [vmem:[#allocation5 + $0x330] ss:$20 sps:$4 sm:$0xff]   ;;  %v6755_v44 = vld [vmem:[#allocation5 + $0x498] ss:$20 sps:$4 sm:$0xff]  }
 0x1f6   :  { %v6756_v45 = vld [vmem:[#allocation5 + $0xd8] ss:$20 sps:$4 sm:$0xff]  }
 0x1f7   :  { %3194 = vmatmul.mubr.bf16.vlgmr.msra.gmra.mrb[8].mxu1 %v7318_v61  ;;  %3323 = vmatmul.mubr.bf16.vlgmr.msra.gmra.mrb[12].mxu0 %v7318_v61 }
 0x1f8   :  { %3205 = vmatpush1.bf16.msra.mxu1 %v6686_v47  ;;  %3334 = vmatpush1.bf16.msra.mxu0 %v6689_v49  ;;  %v6757_v47 = vld [vmem:[#allocation5 + $0x358] ss:$20 sps:$4 sm:$0xff]   ;;  %v6758_v49 = vld [vmem:[#allocation5 + $0x240] ss:$20 sps:$4 sm:$0xff]  }
 0x1f9   :  { %3206 = vmatprep.subr.bf16.mxu1 %v6694_v50  ;;  %3335 = vmatprep.subr.bf16.mxu0 %v6697_v51  ;;  %v6759_v50 = vld [vmem:[#allocation5 + $0x4c0] ss:$20 sps:$4 sm:$0xff]  }
 0x1fa   :  { %3236 = vmatprep.mubr.bf16.mxu1 %v7129_v18  ;;  %3365 = vmatprep.mubr.bf16.mxu0 %v7129_v18  ;;  %v6760_v51 = vld [vmem:[#allocation5 + $0x100] ss:$20 sps:$4 sm:$0xff]  }
 0x1fc   :  { %3207 = vmatpush1.bf16.msra.mxu1 %v6692_v52  ;;  %3336 = vmatpush1.bf16.msra.mxu0 %v6695_v25  ;;  %v6761_v52 = vld [vmem:[#allocation5 + $0x380] ss:$20 sps:$4 sm:$0xff]   ;;  %v6762_v25 = vld [vmem:[#allocation5 + $0x268] ss:$20 sps:$4 sm:$0xff]  }
 0x1fd   :  { %3208 = vmatprep.subr.bf16.mxu1 %v6700_v53  ;;  %3337 = vmatprep.subr.bf16.mxu0 %v6703_v54  ;;  %v6763_v53 = vld [vmem:[#allocation5 + $0x4e8] ss:$20 sps:$4 sm:$0xff]  }
 0x1fe   :  { %v6764_v54 = vld [vmem:[#allocation5 + $0x128] ss:$20 sps:$4 sm:$0xff]  }
 0x200   :  { %3209 = vmatpush1.bf16.msra.mxu1 %v6698_v43  ;;  %3338 = vmatpush1.bf16.msra.mxu0 %v6701_v55  ;;  %v6765_v43 = vld [vmem:[#allocation5 + $0x3a8] ss:$20 sps:$4 sm:$0xff]   ;;  %v6776_v55 = vld [vmem:[#allocation7 + $0x4] ss:$20 sps:$4 sm:$0xff]  }
 0x201   :  { %3210 = vmatprep.subr.bf16.mxu1 %v6706_v56  ;;  %3339 = vmatprep.subr.bf16.mxu0 %v6709_v57  ;;  %v6766_v56 = vld [vmem:[#allocation5 + $0x510] ss:$20 sps:$4 sm:$0xff]   ;;  %v6774_v57 = vld [vmem:[#allocation7] ss:$20 sps:$4 sm:$0xff]  }
 0x204   :  { %3211 = vmatpush1.bf16.msra.mxu1 %v6704_v58  ;;  %3340 = vmatpush1.bf16.msra.mxu0 %v6707_v59  ;;  %v6782_v58 = vld [vmem:[#allocation7 + $0x2c] ss:$20 sps:$4 sm:$0xff]  }
 0x205   :  { %3212 = vmatprep.subr.bf16.mxu1 %v6712_v62  ;;  %3341 = vmatprep.subr.bf16.mxu0 %v6715_v63  ;;  %v6767_v59 = vld [vmem:[#allocation5 + $0x538] ss:$20 sps:$4 sm:$0xff]   ;;  %v6780_v62 = vld [vmem:[#allocation7 + $0x28] ss:$20 sps:$4 sm:$0xff]  }
 0x206   :  { %v6788_v63 = vld [vmem:[#allocation7 + $0x54] ss:$20 sps:$4 sm:$0xff]  }
 0x208   :  { %3213 = vmatpush1.bf16.msra.mxu1 %v6710_v0  ;;  %3342 = vmatpush1.bf16.msra.mxu0 %v6713_v1  ;;  %v6768_v0 = vld [vmem:[#allocation5 + $0x560] ss:$20 sps:$4 sm:$0xff]   ;;  %v6794_v1 = vld [vmem:[#allocation7 + $0x7c] ss:$20 sps:$4 sm:$0xff]  }
 0x209   :  { %3214 = vmatprep.subr.bf16.mxu1 %v6718_v2  ;;  %3343 = vmatprep.subr.bf16.mxu0 %v6721_v3  ;;  %v6792_v2 = vld [vmem:[#allocation7 + $0x78] ss:$20 sps:$4 sm:$0xff]  }
 0x20a   :  { %v6800_v3 = vld [vmem:[#allocation7 + $0xa4] ss:$20 sps:$4 sm:$0xff]  }
 0x20c   :  { %3215 = vmatpush1.bf16.msra.mxu1 %v6716_v4  ;;  %3344 = vmatpush1.bf16.msra.mxu0 %v6719_v5  ;;  %v6770_v4 = vld [vmem:[#allocation5 + $0x5b0] ss:$20 sps:$4 sm:$0xff]   ;;  %v6798_v5 = vld [vmem:[#allocation7 + $0xa0] ss:$20 sps:$4 sm:$0xff]  }
 0x20d   :  { %3216 = vmatprep.subr.bf16.mxu1 %v6724_v8  ;;  %3345 = vmatprep.subr.bf16.mxu0 %v6727_v9  ;;  %v6806_v8 = vld [vmem:[#allocation7 + $0xcc] ss:$20 sps:$4 sm:$0xff]  }
 0x20e   :  { %v6771_v9 = vld [vmem:[#allocation5 + $0x5d8] ss:$20 sps:$4 sm:$0xff]  }
 0x210   :  { %3217 = vmatpush1.bf16.msra.mxu1 %v6722_v10  ;;  %3346 = vmatpush1.bf16.msra.mxu0 %v6725_v11  ;;  %v6804_v10 = vld [vmem:[#allocation7 + $0xc8] ss:$20 sps:$4 sm:$0xff]  }
 0x211   :  { %3218 = vmatprep.subr.bf16.mxu1 %v6730_v12  ;;  %3347 = vmatprep.subr.bf16.mxu0 %v6733_v13  ;;  %v6812_v11 = vld [vmem:[#allocation7 + $0xf4] ss:$20 sps:$4 sm:$0xff]   ;;  %v6810_v13 = vld [vmem:[#allocation7 + $0xf0] ss:$20 sps:$4 sm:$0xff]  }
 0x212   :  { %v6772_v12 = vld [vmem:[#allocation5 + $0x600] ss:$20 sps:$4 sm:$0xff]  }
 0x214   :  { %3219 = vmatpush1.bf16.msra.mxu1 %v6728_v14  ;;  %3348 = vmatpush1.bf16.msra.mxu0 %v6731_v16  ;;  %v6818_v14 = vld [vmem:[#allocation7 + $0x11c] ss:$20 sps:$4 sm:$0xff]  }
 0x215   :  { %5961 = vmatprep.subr.bf16.mxu1 %v6734_v17  ;;  %5983 = vmatprep.subr.bf16.mxu0 %v6735_v19  ;;  %v6773_v16 = vld [vmem:[#allocation5 + $0x628] ss:$20 sps:$4 sm:$0xff]   ;;  %v6779_v17 = vld [vmem:[#allocation7 + $0xc] ss:$20 sps:$4 sm:$0xff]  }
 0x216   :  { %v6816_v19 = vld [vmem:[#allocation7 + $0x118] ss:$20 sps:$4 sm:$0xff]  }
 0x217   :  { %3237 = vmatmul.mubr.bf16.vlgmr.msra.gmra.mrb[8].mxu1 %v7335_v46  ;;  %3366 = vmatmul.mubr.bf16.vlgmr.msra.gmra.mrb[12].mxu0 %v7335_v46 }
 0x218   :  { %5962 = vmatpush3.bf16.msra.mxu1 %v6736_v20  ;;  %3408 = vmatprep.mubr.bf16.mxu1 %v7320_v48  ;;  %v6749_v48 = vld [vmem:[#allocation5 + $0x308] ss:$20 sps:$4 sm:$0xff]   ;;  %v6824_v20 = vld [vmem:[#allocation7 + $0x144] ss:$20 sps:$4 sm:$0xff]  }
 0x219   :  { %5984 = vmatpush3.bf16.msra.mxu0 %v6737_v21  ;;  %3449 = vmatprep.mubr.bf16.mxu0 %v7322_v31  ;;  %v6751_v31 = vld [vmem:[#allocation5 + $0x470] ss:$20 sps:$4 sm:$0xff]   ;;  %v6777_v21 = vld [vmem:[#allocation7 + $0x8] ss:$20 sps:$4 sm:$0xff]  }
 0x21a   :  { %5963 = vmatprep.subr.bf16.mxu1 %v6738_v22  ;;  %5985 = vmatprep.subr.bf16.mxu0 %v6739_v6  ;;  %v6785_v22 = vld [vmem:[#allocation7 + $0x34] ss:$20 sps:$4 sm:$0xff]  }
 0x21b   :  { %v6822_v6 = vld [vmem:[#allocation7 + $0x140] ss:$20 sps:$4 sm:$0xff]  }
 0x21c   :  { %5964 = vmatpush3.bf16.msra.mxu1 %v6740_v23  ;;  %v6830_v23 = vld [vmem:[#allocation7 + $0x16c] ss:$20 sps:$4 sm:$0xff]  }
 0x21d   :  { %5986 = vmatpush3.bf16.msra.mxu0 %v6741_v30  ;;  %5965 = vmatprep.subr.bf16.mxu1 %v6742_v32  ;;  %v6783_v30 = vld [vmem:[#allocation7 + $0x30] ss:$20 sps:$4 sm:$0xff]  }
 0x21e   :  { %5987 = vmatprep.subr.bf16.mxu0 %v6743_v33  ;;  %v6791_v32 = vld [vmem:[#allocation7 + $0x5c] ss:$20 sps:$4 sm:$0xff]  }
 0x21f   :  { %v6828_v33 = vld [vmem:[#allocation7 + $0x168] ss:$20 sps:$4 sm:$0xff]  }
 0x220   :  { %5966 = vmatpush3.bf16.msra.mxu1 %v6744_v34  ;;  %v6836_v34 = vld [vmem:[#allocation7 + $0x194] ss:$20 sps:$4 sm:$0xff]  }
 0x221   :  { %5988 = vmatpush3.bf16.msra.mxu0 %v6745_v35  ;;  %5967 = vmatprep.subr.bf16.mxu1 %v6746_v36  ;;  %v6789_v35 = vld [vmem:[#allocation7 + $0x58] ss:$20 sps:$4 sm:$0xff]  }
 0x222   :  { %5989 = vmatprep.subr.bf16.mxu0 %v6747_v37  ;;  %v6797_v36 = vld [vmem:[#allocation7 + $0x84] ss:$20 sps:$4 sm:$0xff]  }
 0x223   :  { %v6834_v37 = vld [vmem:[#allocation7 + $0x190] ss:$20 sps:$4 sm:$0xff]  }
 0x224   :  { %5968 = vmatpush3.bf16.msra.mxu1 %v6748_v38  ;;  %v6842_v38 = vld [vmem:[#allocation7 + $0x1bc] ss:$20 sps:$4 sm:$0xff]  }
 0x225   :  { %5990 = vmatpush3.bf16.msra.mxu0 %v6749_v48  ;;  %5969 = vmatprep.subr.bf16.mxu1 %v6750_v39  ;;  %v6803_v48 = vld [vmem:[#allocation7 + $0xac] ss:$20 sps:$4 sm:$0xff]  }
 0x226   :  { %5991 = vmatprep.subr.bf16.mxu0 %v6751_v31  ;;  %v6840_v39 = vld [vmem:[#allocation7 + $0x1b8] ss:$20 sps:$4 sm:$0xff]  }
 0x227   :  { %v6848_v31 = vld [vmem:[#allocation7 + $0x1e4] ss:$20 sps:$4 sm:$0xff]  }
 0x228   :  { %5970 = vmatpush3.bf16.msra.mxu1 %v6752_v40  ;;  %v6801_v40 = vld [vmem:[#allocation7 + $0xa8] ss:$20 sps:$4 sm:$0xff]  }
 0x229   :  { %5992 = vmatpush3.bf16.msra.mxu0 %v6753_v41  ;;  %5971 = vmatprep.subr.bf16.mxu1 %v6754_v42  ;;  %v6809_v41 = vld [vmem:[#allocation7 + $0xd4] ss:$20 sps:$4 sm:$0xff]  }
 0x22a   :  { %5993 = vmatprep.subr.bf16.mxu0 %v6755_v44  ;;  %v6846_v42 = vld [vmem:[#allocation7 + $0x1e0] ss:$20 sps:$4 sm:$0xff]  }
 0x22b   :  { %v6854_v44 = vld [vmem:[#allocation7 + $0x20c] ss:$20 sps:$4 sm:$0xff]  }
 0x22c   :  { %5972 = vmatpush3.bf16.msra.mxu1 %v6756_v45  ;;  %v6807_v45 = vld [vmem:[#allocation7 + $0xd0] ss:$20 sps:$4 sm:$0xff]  }
 0x22d   :  { %5994 = vmatpush3.bf16.msra.mxu0 %v6757_v47  ;;  %5973 = vmatprep.subr.bf16.mxu1 %v6758_v49  ;;  %v6815_v47 = vld [vmem:[#allocation7 + $0xfc] ss:$20 sps:$4 sm:$0xff]  }
 0x22e   :  { %5995 = vmatprep.subr.bf16.mxu0 %v6759_v50  ;;  %v6852_v49 = vld [vmem:[#allocation7 + $0x208] ss:$20 sps:$4 sm:$0xff]  }
 0x22f   :  { %v6860_v50 = vld [vmem:[#allocation7 + $0x234] ss:$20 sps:$4 sm:$0xff]  }
 0x230   :  { %5974 = vmatpush3.bf16.msra.mxu1 %v6760_v51  ;;  %v6813_v51 = vld [vmem:[#allocation7 + $0xf8] ss:$20 sps:$4 sm:$0xff]  }
 0x231   :  { %5996 = vmatpush3.bf16.msra.mxu0 %v6761_v52  ;;  %5975 = vmatprep.subr.bf16.mxu1 %v6762_v25  ;;  %v6821_v52 = vld [vmem:[#allocation7 + $0x124] ss:$20 sps:$4 sm:$0xff]  }
 0x232   :  { %5997 = vmatprep.subr.bf16.mxu0 %v6763_v53  ;;  %v6858_v25 = vld [vmem:[#allocation7 + $0x230] ss:$20 sps:$4 sm:$0xff]  }
 0x233   :  { %v6866_v53 = vld [vmem:[#allocation7 + $0x25c] ss:$20 sps:$4 sm:$0xff]  }
 0x234   :  { %5976 = vmatpush3.bf16.msra.mxu1 %v6764_v54  ;;  %v6819_v54 = vld [vmem:[#allocation7 + $0x120] ss:$20 sps:$4 sm:$0xff]  }
 0x235   :  { %5998 = vmatpush3.bf16.msra.mxu0 %v6765_v43  ;;  %6087 = vmatprep.subr.bf16.mxu1 %v7130_v15  ;;  %v6827_v43 = vld [vmem:[#allocation7 + $0x14c] ss:$20 sps:$4 sm:$0xff]  }
 0x236   :  { %4821 = vmatprep.subr.bf16.mxu0 %v6776_v55  ;;  %v6864_v55 = vld [vmem:[#allocation7 + $0x258] ss:$20 sps:$4 sm:$0xff]  }
 0x237   :  { %3409 = vmatmul.mubr.bf16.vlgmr.msra.gmra.mrb[12].mxu1 %v7316_v60  ;;  %v6786_v60 = vld [vmem:[#allocation7 + $0x50] ss:$20 sps:$4 sm:$0xff]  }
 0x238   :  { %3450 = vmatmul.mubr.bf16.vlgmr.msra.gmra.mrb[16].mxu0 %v7318_v61  ;;  %6088 = vmatpush3.bf16.msra.mxu1 %v6766_v56  ;;  %v6769_v61 = vld [vmem:[#allocation5 + $0x588] ss:$20 sps:$4 sm:$0xff]   ;;  %v6872_v56 = vld [vmem:[#allocation7 + $0x284] ss:$20 sps:$4 sm:$0xff]  }
 0x239   :  { %6089 = vmatprep.subr.bf16.mxu1 %v7130_v15  ;;  %6103 = vmatprep.mubr.msk.bf16.mxu1 %vm7131_vm0, %v7130_v15 }
 0x23a   :  { %4822 = vmatpush1.bf16.msra.mxu0 %v6774_v57  ;;  %v6825_v57 = vld [vmem:[#allocation7 + $0x148] ss:$20 sps:$4 sm:$0xff]  }
 0x23b   :  { %4823 = vmatprep.subr.bf16.mxu0 %v6782_v58  ;;  %v6833_v58 = vld [vmem:[#allocation7 + $0x174] ss:$20 sps:$4 sm:$0xff]  }
 0x23c   :  { %6090 = vmatpush3.bf16.msra.mxu1 %v6767_v59  ;;  %v6831_v59 = vld [vmem:[#allocation7 + $0x170] ss:$20 sps:$4 sm:$0xff]  }
 0x23d   :  { %6091 = vmatprep.subr.bf16.mxu1 %v7130_v15 }
 0x23e   :  { %4824 = vmatpush1.bf16.msra.mxu0 %v6780_v62  ;;  %v6839_v62 = vld [vmem:[#allocation7 + $0x19c] ss:$20 sps:$4 sm:$0xff]  }
 0x23f   :  { %4825 = vmatprep.subr.bf16.mxu0 %v6788_v63  ;;  %v6837_v63 = vld [vmem:[#allocation7 + $0x198] ss:$20 sps:$4 sm:$0xff]  }
 0x240   :  { %6092 = vmatpush3.bf16.msra.mxu1 %v6768_v0  ;;  %v6845_v0 = vld [vmem:[#allocation7 + $0x1c4] ss:$20 sps:$4 sm:$0xff]  }
 0x241   :  { %6093 = vmatprep.subr.bf16.mxu1 %v7130_v15 }
 0x242   :  { %4826 = vmatpush1.bf16.msra.mxu0 %v6786_v60  ;;  %v6843_v60 = vld [vmem:[#allocation7 + $0x1c0] ss:$20 sps:$4 sm:$0xff]  }
 0x243   :  { %4827 = vmatprep.subr.bf16.mxu0 %v6794_v1  ;;  %v6851_v1 = vld [vmem:[#allocation7 + $0x1ec] ss:$20 sps:$4 sm:$0xff]  }
 0x244   :  { %6094 = vmatpush3.bf16.msra.mxu1 %v6769_v61  ;;  %v6849_v61 = vld [vmem:[#allocation7 + $0x1e8] ss:$20 sps:$4 sm:$0xff]  }
 0x245   :  { %6095 = vmatprep.subr.bf16.mxu1 %v7130_v15 }
 0x246   :  { %4828 = vmatpush1.bf16.msra.mxu0 %v6792_v2  ;;  %v6857_v2 = vld [vmem:[#allocation7 + $0x214] ss:$20 sps:$4 sm:$0xff]  }
 0x247   :  { %4829 = vmatprep.subr.bf16.mxu0 %v6800_v3  ;;  %v6855_v3 = vld [vmem:[#allocation7 + $0x210] ss:$20 sps:$4 sm:$0xff]  }
 0x248   :  { %6096 = vmatpush3.bf16.msra.mxu1 %v6770_v4  ;;  %v6863_v4 = vld [vmem:[#allocation7 + $0x23c] ss:$20 sps:$4 sm:$0xff]  }
 0x249   :  { %6097 = vmatprep.subr.bf16.mxu1 %v7130_v15 }
 0x24a   :  { %4830 = vmatpush1.bf16.msra.mxu0 %v6798_v5  ;;  %v6861_v5 = vld [vmem:[#allocation7 + $0x238] ss:$20 sps:$4 sm:$0xff]  }
 0x24b   :  { %4831 = vmatprep.subr.bf16.mxu0 %v6806_v8  ;;  %v6869_v8 = vld [vmem:[#allocation7 + $0x264] ss:$20 sps:$4 sm:$0xff]  }
 0x24c   :  { %6098 = vmatpush3.bf16.msra.mxu1 %v6771_v9  ;;  %v6867_v9 = vld [vmem:[#allocation7 + $0x260] ss:$20 sps:$4 sm:$0xff]  }
 0x24d   :  { %6099 = vmatprep.subr.bf16.mxu1 %v7130_v15 }
 0x24e   :  { %4832 = vmatpush1.bf16.msra.mxu0 %v6804_v10  ;;  %v6875_v10 = vld [vmem:[#allocation7 + $0x28c] ss:$20 sps:$4 sm:$0xff]  }
 0x24f   :  { %4833 = vmatprep.subr.bf16.mxu0 %v6812_v11  ;;  %v7361_v11 = vld [vmem:[%s7445_s4] sm:$0x1f] }
 0x250   :  { %6100 = vmatpush3.bf16.msra.mxu1 %v6772_v12  ;;  %v2056_v12 = vrot.slane %v7361_v11, %v7297_v26 }
 0x251   :  { %6101 = vmatprep.subr.bf16.mxu1 %v7130_v15 }
 0x252   :  { %4834 = vmatpush1.bf16.msra.mxu0 %v6810_v13  ;;  %v2064_v13 = vrot.slane %v7361_v11, %v7300_v27 }
 0x253   :  { %4835 = vmatprep.subr.bf16.mxu0 %v6818_v14  ;;  %v2060_v14 = vrot.slane %v7361_v11, %v7303_v28 }
 0x254   :  { %6102 = vmatpush3.bf16.msra.mxu1 %v6773_v16  ;;  %v2068_v16 = vrot.slane %v7361_v11, %v7306_v29 }
 0x255   :  { %4950 = vmatprep.subr.bf16.mxu1 %v6779_v17 }
 0x256   :  { %4836 = vmatpush1.bf16.msra.mxu0 %v6816_v19 }
 0x257   :  { %6104 = vmatmul.mubr.bf16.vlgmr.msra.gmra.mrb[16].mxu1 %v7335_v46  ;;  %4837 = vmatprep.subr.bf16.mxu0 %v6824_v20  ;;  %v6795_v46 = vld [vmem:[#allocation7 + $0x80] ss:$20 sps:$4 sm:$0xff]  }
 0x258   :  { %4951 = vmatpush1.bf16.msra.mxu1 %v6777_v21 }
 0x259   :  { %4952 = vmatprep.subr.bf16.mxu1 %v6785_v22 }
 0x25a   :  { %4838 = vmatpush1.bf16.msra.mxu0 %v6822_v6 }
 0x25b   :  { %4839 = vmatprep.subr.bf16.mxu0 %v6830_v23 }
 0x25c   :  { %4953 = vmatpush1.bf16.msra.mxu1 %v6783_v30 }
 0x25d   :  { %4954 = vmatprep.subr.bf16.mxu1 %v6791_v32 }
 0x25e   :  { %4840 = vmatpush1.bf16.msra.mxu0 %v6828_v33 }
 0x25f   :  { %4841 = vmatprep.subr.bf16.mxu0 %v6836_v34 }
 0x260   :  { %4955 = vmatpush1.bf16.msra.mxu1 %v6789_v35 }
 0x261   :  { %4956 = vmatprep.subr.bf16.mxu1 %v6797_v36 }
 0x262   :  { %4842 = vmatpush1.bf16.msra.mxu0 %v6834_v37 }
 0x263   :  { %4843 = vmatprep.subr.bf16.mxu0 %v6842_v38 }
 0x264   :  { %4957 = vmatpush1.bf16.msra.mxu1 %v6795_v46 }
 0x265   :  { %4958 = vmatprep.subr.bf16.mxu1 %v6803_v48 }
 0x266   :  { %4844 = vmatpush1.bf16.msra.mxu0 %v6840_v39 }
 0x267   :  { %4845 = vmatprep.subr.bf16.mxu0 %v6848_v31 }
 0x268   :  { %4959 = vmatpush1.bf16.msra.mxu1 %v6801_v40 }
 0x269   :  { %4960 = vmatprep.subr.bf16.mxu1 %v6809_v41 }
 0x26a   :  { %4846 = vmatpush1.bf16.msra.mxu0 %v6846_v42 }
 0x26b   :  { %4847 = vmatprep.subr.bf16.mxu0 %v6854_v44 }
 0x26c   :  { %4961 = vmatpush1.bf16.msra.mxu1 %v6807_v45 }
 0x26d   :  { %4962 = vmatprep.subr.bf16.mxu1 %v6815_v47 }
 0x26e   :  { %4848 = vmatpush1.bf16.msra.mxu0 %v6852_v49 }
 0x26f   :  { %4849 = vmatprep.subr.bf16.mxu0 %v6860_v50 }
 0x270   :  { %4963 = vmatpush1.bf16.msra.mxu1 %v6813_v51 }
 0x271   :  { %4964 = vmatprep.subr.bf16.mxu1 %v6821_v52  ;;  %v6870_v52 = vld [vmem:[#allocation7 + $0x280] ss:$20 sps:$4 sm:$0xff]  }
 0x272   :  { %4850 = vmatpush1.bf16.msra.mxu0 %v6858_v25  ;;  %v6873_v25 = vld [vmem:[#allocation7 + $0x288] ss:$20 sps:$4 sm:$0xff]  }
 0x273   :  { %4851 = vmatprep.subr.bf16.mxu0 %v6866_v53  ;;  %v6878_v53 = vld [vmem:[#allocation7 + $0x2ac] ss:$20 sps:$4 sm:$0xff]  }
 0x274   :  { %4965 = vmatpush1.bf16.msra.mxu1 %v6819_v54  ;;  %v6881_v54 = vld [vmem:[#allocation7 + $0x2b4] ss:$20 sps:$4 sm:$0xff]  }
 0x275   :  { %4966 = vmatprep.subr.bf16.mxu1 %v6827_v43  ;;  %v6876_v43 = vld [vmem:[#allocation7 + $0x2a8] ss:$20 sps:$4 sm:$0xff]  }
 0x276   :  { %4852 = vmatpush1.bf16.msra.mxu0 %v6864_v55  ;;  %v6879_v55 = vld [vmem:[#allocation7 + $0x2b0] ss:$20 sps:$4 sm:$0xff]  }
 0x277   :  { %4864 = vmatprep.subr.bf16.mxu0 %v6872_v56  ;;  %v6884_v56 = vld [vmem:[#allocation7 + $0x2d4] ss:$20 sps:$4 sm:$0xff]  }
 0x278   :  { %4967 = vmatpush1.bf16.msra.mxu1 %v6825_v57  ;;  %v6887_v57 = vld [vmem:[#allocation7 + $0x2dc] ss:$20 sps:$4 sm:$0xff]  }
 0x279   :  { %4968 = vmatprep.subr.bf16.mxu1 %v6833_v58  ;;  %v6882_v58 = vld [vmem:[#allocation7 + $0x2d0] ss:$20 sps:$4 sm:$0xff]  }
 0x27c   :  { %4969 = vmatpush1.bf16.msra.mxu1 %v6831_v59  ;;  %v6885_v59 = vld [vmem:[#allocation7 + $0x2d8] ss:$20 sps:$4 sm:$0xff]  }
 0x27d   :  { %4970 = vmatprep.subr.bf16.mxu1 %v6839_v62  ;;  %v6890_v62 = vld [vmem:[#allocation7 + $0x2fc] ss:$20 sps:$4 sm:$0xff]  }
 0x280   :  { %4971 = vmatpush1.bf16.msra.mxu1 %v6837_v63  ;;  %v6893_v63 = vld [vmem:[#allocation7 + $0x304] ss:$20 sps:$4 sm:$0xff]  }
 0x281   :  { %4972 = vmatprep.subr.bf16.mxu1 %v6845_v0  ;;  %v6888_v0 = vld [vmem:[#allocation7 + $0x2f8] ss:$20 sps:$4 sm:$0xff]  }
 0x284   :  { %4973 = vmatpush1.bf16.msra.mxu1 %v6843_v60  ;;  %v6891_v60 = vld [vmem:[#allocation7 + $0x300] ss:$20 sps:$4 sm:$0xff]  }
 0x285   :  { %4974 = vmatprep.subr.bf16.mxu1 %v6851_v1  ;;  %v6896_v1 = vld [vmem:[#allocation7 + $0x324] ss:$20 sps:$4 sm:$0xff]  }
 0x288   :  { %4975 = vmatpush1.bf16.msra.mxu1 %v6849_v61  ;;  %v6899_v61 = vld [vmem:[#allocation7 + $0x32c] ss:$20 sps:$4 sm:$0xff]  }
 0x289   :  { %4976 = vmatprep.subr.bf16.mxu1 %v6857_v2  ;;  %v6894_v2 = vld [vmem:[#allocation7 + $0x320] ss:$20 sps:$4 sm:$0xff]  }
 0x28c   :  { %4977 = vmatpush1.bf16.msra.mxu1 %v6855_v3  ;;  %v6897_v3 = vld [vmem:[#allocation7 + $0x328] ss:$20 sps:$4 sm:$0xff]  }
 0x28d   :  { %4978 = vmatprep.subr.bf16.mxu1 %v6863_v4  ;;  %v6902_v4 = vld [vmem:[#allocation7 + $0x34c] ss:$20 sps:$4 sm:$0xff]  }
 0x290   :  { %4979 = vmatpush1.bf16.msra.mxu1 %v6861_v5  ;;  %v6905_v5 = vld [vmem:[#allocation7 + $0x354] ss:$20 sps:$4 sm:$0xff]  }
 0x291   :  { %4980 = vmatprep.subr.bf16.mxu1 %v6869_v8  ;;  %v6900_v8 = vld [vmem:[#allocation7 + $0x348] ss:$20 sps:$4 sm:$0xff]  }
 0x294   :  { %4981 = vmatpush1.bf16.msra.mxu1 %v6867_v9  ;;  %v6903_v9 = vld [vmem:[#allocation7 + $0x350] ss:$20 sps:$4 sm:$0xff]  }
 0x295   :  { %4993 = vmatprep.subr.bf16.mxu1 %v6875_v10  ;;  %v6908_v10 = vld [vmem:[#allocation7 + $0x374] ss:$20 sps:$4 sm:$0xff]  }
 0x2ea   :  { %v3238_v17 = vpop.f32.mrb[8].mxu1  ;;  %v3367_v19 = vpop.f32.mrb[12].mxu0 }
 0x2eb   :  { %v6135_v20 = vadd.f32 %v3238_v17, %v2056_v12  ;;  %v6139_v21 = vadd.f32 %v3367_v19, %v2064_v13  ;;  %v3240_v22 = vpop.f32.mrb[9].mxu1  ;;  %v3369_v6 = vpop.f32.mrb[13].mxu0  ;;  %v6909_v17 = vld [vmem:[#allocation7 + $0x378] ss:$20 sps:$4 sm:$0xff]  }
 0x2ec   :  { %v6136_v23 = vadd.f32 %v3240_v22, %v2060_v14  ;;  %v6140_v30 = vadd.f32 %v3369_v6, %v2068_v16  ;;  %v3242_v32 = vpop.f32.mrb[10].mxu1  ;;  %v3371_v33 = vpop.f32.mrb[14].mxu0  ;;  %v6917_v22 = vld [vmem:[#allocation7 + $0x3a4] ss:$20 sps:$4 sm:$0xff]  }
 0x2ed   :  { %v6137_v34 = vadd.f32 %v3242_v32, %v2056_v12  ;;  %v6141_v35 = vadd.f32 %v3371_v33, %v2064_v13  ;;  %v3244_v36 = vpop.f32.mrb[11].mxu1  ;;  %v3373_v37 = vpop.f32.mrb[15].mxu0  ;;  %v3499_v48 = vmax.f32 %v6135_v20, 0.0  ;;  %v3501_v39 = vmax.f32 %v6139_v21, 0.0  ;;  %v6911_v12 = vld [vmem:[#allocation7 + $0x37c] ss:$20 sps:$4 sm:$0xff]  }
 0x2ee   :  { %v6138_v38 = vadd.f32 %v3244_v36, %v2060_v14  ;;  %v6142_v46 = vadd.f32 %v3373_v37, %v2068_v16  ;;  %v3500_v41 = vmax.f32 %v6136_v23, 0.0  ;;  %v3502_v42 = vmax.f32 %v6140_v30, 0.0  ;;  %v6906_v16 = vld [vmem:[#allocation7 + $0x370] ss:$20 sps:$4 sm:$0xff]  }
 0x2ef   :  { %v3504_v31 = vmax.f32 %v6137_v34, 0.0  ;;  %v3506_v40 = vmax.f32 %v6141_v35, 0.0  ;;  %v2072_v14 = vrot.slane %v7361_v11, %v7331_v7  ;;  %v6914_v21 = vld [vmem:[#allocation7 + $0x39c] ss:$20 sps:$4 sm:$0xff]   ;;  %v6912_v11 = vld [vmem:[#allocation7 + $0x398] ss:$20 sps:$4 sm:$0xff]  }
 0x2f0   :  { %v3505_v44 = vmax.f32 %v6138_v38, 0.0  ;;  %v3507_v45 = vmax.f32 %v6142_v46, 0.0  ;;  %v6915_v38 = vld [vmem:[#allocation7 + $0x3a0] ss:$20 sps:$4 sm:$0xff]  }
 0x2f1   :  { %v7371_v47 = vpack.c.bf16 %v3504_v31, %v3499_v48  ;;  %v7373_v49 = vpack.c.bf16 %v3506_v40, %v3501_v39  ;;  %v6920_v48 = vld [vmem:[#allocation7 + $0x3c4] ss:$20 sps:$4 sm:$0xff]   ;;  %v6923_v39 = vld [vmem:[#allocation7 + $0x3cc] ss:$20 sps:$4 sm:$0xff]  }
 0x2f2   :  { %v7375_v50 = vpack.c.bf16 %v3505_v44, %v3500_v41  ;;  %v7377_v51 = vpack.c.bf16 %v3507_v45, %v3502_v42  ;;  %v6918_v41 = vld [vmem:[#allocation7 + $0x3c0] ss:$20 sps:$4 sm:$0xff]   ;;  %v6921_v42 = vld [vmem:[#allocation7 + $0x3c8] ss:$20 sps:$4 sm:$0xff]  }
 0x2f3   :  { %v6926_v45 = vld [vmem:[#allocation7 + $0x3ec] ss:$20 sps:$4 sm:$0xff]  }
 0x2f4   :  { %4853 = vmatprep.mubr.bf16.mxu0 %v7375_v50  ;;  %4982 = vmatprep.mubr.bf16.mxu1 %v7375_v50 }
 0x2f5   :  { %4854 = vmatmul.mubr.bf16.vlgmr.msra.gmra.mrb[20].mxu0 %v7371_v47  ;;  %4983 = vmatmul.mubr.bf16.vlgmr.msra.gmra.mrb[20].mxu1 %v7371_v47 }
 0x2f6   :  { %4865 = vmatpush1.bf16.msra.mxu0 %v6870_v52  ;;  %4994 = vmatpush1.bf16.msra.mxu1 %v6873_v25  ;;  %v6929_v52 = vld [vmem:[#allocation7 + $0x3f4] ss:$20 sps:$4 sm:$0xff]  }
 0x2f7   :  { %4896 = vmatprep.mubr.bf16.mxu0 %v7377_v51  ;;  %5025 = vmatprep.mubr.bf16.mxu1 %v7377_v51  ;;  %v6924_v25 = vld [vmem:[#allocation7 + $0x3e8] ss:$20 sps:$4 sm:$0xff]  }
 0x2f8   :  { %4866 = vmatprep.subr.bf16.mxu0 %v6878_v53  ;;  %4995 = vmatprep.subr.bf16.mxu1 %v6881_v54  ;;  %v6927_v53 = vld [vmem:[#allocation7 + $0x3f0] ss:$20 sps:$4 sm:$0xff]   ;;  %v6932_v54 = vld [vmem:[#allocation7 + $0x414] ss:$20 sps:$4 sm:$0xff]  }
 0x2fa   :  { %4867 = vmatpush1.bf16.msra.mxu0 %v6876_v43  ;;  %4996 = vmatpush1.bf16.msra.mxu1 %v6879_v55  ;;  %v6935_v43 = vld [vmem:[#allocation7 + $0x41c] ss:$20 sps:$4 sm:$0xff]  }
 0x2fb   :  { %4868 = vmatprep.subr.bf16.mxu0 %v6884_v56  ;;  %4997 = vmatprep.subr.bf16.mxu1 %v6887_v57  ;;  %v6930_v55 = vld [vmem:[#allocation7 + $0x410] ss:$20 sps:$4 sm:$0xff]   ;;  %v6933_v56 = vld [vmem:[#allocation7 + $0x418] ss:$20 sps:$4 sm:$0xff]  }
 0x2fc   :  { %v6938_v57 = vld [vmem:[#allocation7 + $0x43c] ss:$20 sps:$4 sm:$0xff]  }
 0x2fe   :  { %4869 = vmatpush1.bf16.msra.mxu0 %v6882_v58  ;;  %4998 = vmatpush1.bf16.msra.mxu1 %v6885_v59  ;;  %v6941_v58 = vld [vmem:[#allocation7 + $0x444] ss:$20 sps:$4 sm:$0xff]  }
 0x2ff   :  { %4870 = vmatprep.subr.bf16.mxu0 %v6890_v62  ;;  %4999 = vmatprep.subr.bf16.mxu1 %v6893_v63  ;;  %v6936_v59 = vld [vmem:[#allocation7 + $0x438] ss:$20 sps:$4 sm:$0xff]   ;;  %v6939_v62 = vld [vmem:[#allocation7 + $0x440] ss:$20 sps:$4 sm:$0xff]  }
 0x300   :  { %v6944_v63 = vld [vmem:[#allocation7 + $0x464] ss:$20 sps:$4 sm:$0xff]  }
 0x302   :  { %4871 = vmatpush1.bf16.msra.mxu0 %v6888_v0  ;;  %5000 = vmatpush1.bf16.msra.mxu1 %v6891_v60  ;;  %v6947_v0 = vld [vmem:[#allocation7 + $0x46c] ss:$20 sps:$4 sm:$0xff]  }
 0x303   :  { %4872 = vmatprep.subr.bf16.mxu0 %v6896_v1  ;;  %5001 = vmatprep.subr.bf16.mxu1 %v6899_v61  ;;  %v6942_v60 = vld [vmem:[#allocation7 + $0x460] ss:$20 sps:$4 sm:$0xff]   ;;  %v6945_v1 = vld [vmem:[#allocation7 + $0x468] ss:$20 sps:$4 sm:$0xff]  }
 0x304   :  { %v6950_v61 = vld [vmem:[#allocation7 + $0x48c] ss:$20 sps:$4 sm:$0xff]  }
 0x306   :  { %4873 = vmatpush1.bf16.msra.mxu0 %v6894_v2  ;;  %5002 = vmatpush1.bf16.msra.mxu1 %v6897_v3  ;;  %v6953_v2 = vld [vmem:[#allocation7 + $0x494] ss:$20 sps:$4 sm:$0xff]  }
 0x307   :  { %4874 = vmatprep.subr.bf16.mxu0 %v6902_v4  ;;  %5003 = vmatprep.subr.bf16.mxu1 %v6905_v5  ;;  %v6948_v3 = vld [vmem:[#allocation7 + $0x488] ss:$20 sps:$4 sm:$0xff]   ;;  %v6951_v4 = vld [vmem:[#allocation7 + $0x490] ss:$20 sps:$4 sm:$0xff]  }
 0x308   :  { %v6956_v5 = vld [vmem:[#allocation7 + $0x4b4] ss:$20 sps:$4 sm:$0xff]  }
 0x30a   :  { %4875 = vmatpush1.bf16.msra.mxu0 %v6900_v8  ;;  %5004 = vmatpush1.bf16.msra.mxu1 %v6903_v9  ;;  %v5977_v13 = vpop.f32.mrb[12].mxu1  ;;  %v6959_v8 = vld [vmem:[#allocation7 + $0x4bc] ss:$20 sps:$4 sm:$0xff]  }
 0x30b   :  { %v5999_v19 = vpop.f32.mrb[16].mxu0  ;;  %v5978_v20 = vpop.f32.mrb[13].mxu1  ;;  %4876 = vmatprep.subr.bf16.mxu0 %v6908_v10  ;;  %5005 = vmatprep.subr.bf16.mxu1 %v6911_v12  ;;  %v6954_v10 = vld [vmem:[#allocation7 + $0x4b0] ss:$20 sps:$4 sm:$0xff]   ;;  %v6957_v12 = vld [vmem:[#allocation7 + $0x4b8] ss:$20 sps:$4 sm:$0xff]  }
 0x30c   :  { %v5979_v6 = vadd.f32 %v5978_v20, %v5977_v13  ;;  %v6000_v23 = vpop.f32.mrb[17].mxu0  ;;  %v5980_v30 = vpop.f32.mrb[14].mxu1 }
 0x30d   :  { %v6001_v32 = vadd.f32 %v6000_v23, %v5999_v19  ;;  %v6002_v33 = vpop.f32.mrb[18].mxu0  ;;  %v5981_v34 = vpop.f32.mrb[15].mxu1 }
 0x30e   :  { %v3411_v35 = vadd.f32 %v5979_v6, %v2072_v14  ;;  %v5982_v36 = vadd.f32 %v5981_v34, %v5980_v30  ;;  %v6003_v37 = vpop.f32.mrb[19].mxu0  ;;  %4877 = vmatpush1.bf16.msra.mxu0 %v6906_v16  ;;  %5006 = vmatpush1.bf16.msra.mxu1 %v6909_v17  ;;  %v6962_v16 = vld [vmem:[#allocation7 + $0x4dc] ss:$20 sps:$4 sm:$0xff]   ;;  %v6965_v17 = vld [vmem:[#allocation7 + $0x4e4] ss:$20 sps:$4 sm:$0xff]  }
 0x30f   :  { %v6004_v46 = vadd.f32 %v6003_v37, %v6002_v33  ;;  %4878 = vmatprep.subr.bf16.mxu0 %v6914_v21  ;;  %5007 = vmatprep.subr.bf16.mxu1 %v6917_v22  ;;  %v6960_v22 = vld [vmem:[#allocation7 + $0x4d8] ss:$20 sps:$4 sm:$0xff]   ;;  %v6963_v6 = vld [vmem:[#allocation7 + $0x4e0] ss:$20 sps:$4 sm:$0xff]  }
 0x310   :  { %v3414_v31 = vadd.f32 %v5982_v36, %v2072_v14  ;;  %v3452_v40 = vadd.f32 %v6001_v32, %v3411_v35  ;;  %v6968_v32 = vld [vmem:[#allocation7 + $0x504] ss:$20 sps:$4 sm:$0xff]   ;;  %v6971_v33 = vld [vmem:[#allocation7 + $0x50c] ss:$20 sps:$4 sm:$0xff]   ;;  %v6969_v36 = vld [vmem:[#allocation7 + $0x508] ss:$20 sps:$4 sm:$0xff]  }
 0x311   :  { %v6966_v35 = vld [vmem:[#allocation7 + $0x500] ss:$20 sps:$4 sm:$0xff]  }
 0x312   :  { %4879 = vmatpush1.bf16.msra.mxu0 %v6912_v11  ;;  %5008 = vmatpush1.bf16.msra.mxu1 %v6915_v38  ;;  %v3455_v44 = vadd.f32 %v6004_v46, %v3414_v31  ;;  %v6974_v37 = vld [vmem:[#allocation7 + $0x52c] ss:$20 sps:$4 sm:$0xff]   ;;  %v6977_v11 = vld [vmem:[#allocation7 + $0x534] ss:$20 sps:$4 sm:$0xff]   ;;  %v6975_v46 = vld [vmem:[#allocation7 + $0x530] ss:$20 sps:$4 sm:$0xff]  }
 0x313   :  { %4880 = vmatprep.subr.bf16.mxu0 %v6920_v48  ;;  %5009 = vmatprep.subr.bf16.mxu1 %v6923_v39  ;;  %v6972_v38 = vld [vmem:[#allocation7 + $0x528] ss:$20 sps:$4 sm:$0xff]   ;;  %v6978_v31 = vld [vmem:[#allocation7 + $0x550] ss:$20 sps:$4 sm:$0xff]  }
 0x314   :  { %v6980_v48 = vld [vmem:[#allocation7 + $0x554] ss:$20 sps:$4 sm:$0xff]   ;;  %v6983_v39 = vld [vmem:[#allocation7 + $0x55c] ss:$20 sps:$4 sm:$0xff]  }
 0x316   :  { %4881 = vmatpush1.bf16.msra.mxu0 %v6918_v41  ;;  %5010 = vmatpush1.bf16.msra.mxu1 %v6921_v42  ;;  %v6986_v41 = vld [vmem:[#allocation7 + $0x57c] ss:$20 sps:$4 sm:$0xff]   ;;  %v6989_v42 = vld [vmem:[#allocation7 + $0x584] ss:$20 sps:$4 sm:$0xff]  }
 0x317   :  { %4882 = vmatprep.subr.bf16.mxu0 %v6926_v45  ;;  %5011 = vmatprep.subr.bf16.mxu1 %v6929_v52  ;;  %v6987_v45 = vld [vmem:[#allocation7 + $0x580] ss:$20 sps:$4 sm:$0xff]   ;;  %v6992_v52 = vld [vmem:[#allocation7 + $0x5a4] ss:$20 sps:$4 sm:$0xff]  }
 0x31a   :  { %4883 = vmatpush1.bf16.msra.mxu0 %v6924_v25  ;;  %5012 = vmatpush1.bf16.msra.mxu1 %v6927_v53  ;;  %v6995_v25 = vld [vmem:[#allocation7 + $0x5ac] ss:$20 sps:$4 sm:$0xff]  }
 0x31b   :  { %4884 = vmatprep.subr.bf16.mxu0 %v6932_v54  ;;  %5013 = vmatprep.subr.bf16.mxu1 %v6935_v43  ;;  %v6990_v53 = vld [vmem:[#allocation7 + $0x5a0] ss:$20 sps:$4 sm:$0xff]  }
 0x31c   :  { %v6998_v54 = vld [vmem:[#allocation7 + $0x5cc] ss:$20 sps:$4 sm:$0xff]   ;;  %v7001_v43 = vld [vmem:[#allocation7 + $0x5d4] ss:$20 sps:$4 sm:$0xff]  }
 0x31e   :  { %4885 = vmatpush1.bf16.msra.mxu0 %v6930_v55  ;;  %5014 = vmatpush1.bf16.msra.mxu1 %v6933_v56  ;;  %v6996_v55 = vld [vmem:[#allocation7 + $0x5c8] ss:$20 sps:$4 sm:$0xff]   ;;  %v6999_v56 = vld [vmem:[#allocation7 + $0x5d0] ss:$20 sps:$4 sm:$0xff]  }
 0x31f   :  { %4886 = vmatprep.subr.bf16.mxu0 %v6938_v57  ;;  %5015 = vmatprep.subr.bf16.mxu1 %v6941_v58  ;;  %v7004_v57 = vld [vmem:[#allocation7 + $0x5f4] ss:$20 sps:$4 sm:$0xff]   ;;  %v7007_v58 = vld [vmem:[#allocation7 + $0x5fc] ss:$20 sps:$4 sm:$0xff]  }
 0x322   :  { %4887 = vmatpush1.bf16.msra.mxu0 %v6936_v59  ;;  %5016 = vmatpush1.bf16.msra.mxu1 %v6939_v62  ;;  %v7002_v59 = vld [vmem:[#allocation7 + $0x5f0] ss:$20 sps:$4 sm:$0xff]   ;;  %v7005_v62 = vld [vmem:[#allocation7 + $0x5f8] ss:$20 sps:$4 sm:$0xff]  }
 0x323   :  { %4888 = vmatprep.subr.bf16.mxu0 %v6944_v63  ;;  %5017 = vmatprep.subr.bf16.mxu1 %v6947_v0  ;;  %v7010_v63 = vld [vmem:[#allocation7 + $0x61c] ss:$20 sps:$4 sm:$0xff]   ;;  %v7013_v0 = vld [vmem:[#allocation7 + $0x624] ss:$20 sps:$4 sm:$0xff]  }
 0x326   :  { %4889 = vmatpush1.bf16.msra.mxu0 %v6942_v60  ;;  %5018 = vmatpush1.bf16.msra.mxu1 %v6945_v1  ;;  %v7008_v60 = vld [vmem:[#allocation7 + $0x618] ss:$20 sps:$4 sm:$0xff]   ;;  %v7011_v1 = vld [vmem:[#allocation7 + $0x620] ss:$20 sps:$4 sm:$0xff]  }
 0x327   :  { %4890 = vmatprep.subr.bf16.mxu0 %v6950_v61  ;;  %5019 = vmatprep.subr.bf16.mxu1 %v6953_v2  ;;  %v7014_v61 = vld [vmem:[#allocation7 + $0x150] ss:$20 sps:$4 sm:$0xff]  }
 0x328   :  { %v7015_v2 = vld [vmem:[#allocation7 + $0x3d0] ss:$20 sps:$4 sm:$0xff]  }
 0x32a   :  { %4891 = vmatpush1.bf16.msra.mxu0 %v6948_v3  ;;  %5020 = vmatpush1.bf16.msra.mxu1 %v6951_v4  ;;  %v3492_v9 = vpop.f32.mrb[16].mxu1  ;;  %v7016_v3 = vld [vmem:[#allocation7 + $0x10] ss:$20 sps:$4 sm:$0xff]  }
 0x32b   :  { %v3493_v13 = vadd.f32 %v3492_v9, %v3452_v40  ;;  %v6105_v14 = vpop.f32.mrb[17].mxu1  ;;  %4892 = vmatprep.subr.bf16.mxu0 %v6956_v5  ;;  %5021 = vmatprep.subr.bf16.mxu1 %v6959_v8  ;;  %v6981_v40 = vld [vmem:[#allocation7 + $0x558] ss:$20 sps:$4 sm:$0xff]   ;;  %v7017_v4 = vld [vmem:[#allocation7 + $0x290] ss:$20 sps:$4 sm:$0xff]  }
 0x32c   :  { %v3495_v19 = vpop.f32.mrb[18].mxu1  ;;  %v7018_v5 = vld [vmem:[#allocation7 + $0x178] ss:$20 sps:$4 sm:$0xff]   ;;  %v7024_v14 = vld [vmem:[#allocation7 + $0x60] ss:$20 sps:$4 sm:$0xff]  }
 0x32d   :  { %v3496_v20 = vadd.f32 %v3495_v19, %v3455_v44  ;;  %v6106_v21 = vpop.f32.mrb[19].mxu1  ;;  %v3503_v23 = vmax.f32 %v3493_v13, 0.0  ;;  %v6984_v44 = vld [vmem:[#allocation7 + $0x578] ss:$20 sps:$4 sm:$0xff]   ;;  %v7023_v13 = vld [vmem:[#allocation7 + $0x420] ss:$20 sps:$4 sm:$0xff]  }
 0x32e   :  { %4893 = vmatpush1.bf16.msra.mxu0 %v6954_v10  ;;  %5022 = vmatpush1.bf16.msra.mxu1 %v6957_v12  ;;  %v7019_v8 = vld [vmem:[#allocation7 + $0x3f8] ss:$20 sps:$4 sm:$0xff]   ;;  %v7022_v12 = vld [vmem:[#allocation7 + $0x1a0] ss:$20 sps:$4 sm:$0xff]   ;;  %v7027_v19 = vld [vmem:[#allocation7 + $0x448] ss:$20 sps:$4 sm:$0xff]  }
 0x32f   :  { %v3508_v30 = vmax.f32 %v3496_v20, 0.0  ;;  %4894 = vmatprep.subr.bf16.mxu0 %v6962_v16  ;;  %5023 = vmatprep.subr.bf16.mxu1 %v6965_v17  ;;  %v7020_v9 = vld [vmem:[#allocation7 + $0x38] ss:$20 sps:$4 sm:$0xff]   ;;  %v7025_v16 = vld [vmem:[#allocation7 + $0x2e0] ss:$20 sps:$4 sm:$0xff]  }
 0x330   :  { %v7021_v10 = vld [vmem:[#allocation7 + $0x2b8] ss:$20 sps:$4 sm:$0xff]   ;;  %v7026_v17 = vld [vmem:[#allocation7 + $0x1c8] ss:$20 sps:$4 sm:$0xff]   ;;  %v7030_v21 = vld [vmem:[#allocation7 + $0x1f0] ss:$20 sps:$4 sm:$0xff]  }
 0x331   :  { %v7387_v34 = vpack.c.bf16 %v3508_v30, %v3503_v23  ;;  %v7028_v20 = vld [vmem:[#allocation7 + $0x88] ss:$20 sps:$4 sm:$0xff]   ;;  %v7034_v23 = vld [vmem:[#allocation7 + $0x218] ss:$20 sps:$4 sm:$0xff]  }
 0x332   :  { %4895 = vmatpush1.bf16.msra.mxu0 %v6960_v22  ;;  %5024 = vmatpush1.bf16.msra.mxu1 %v6963_v6  ;;  %v7032_v22 = vld [vmem:[#allocation7 + $0xb0] ss:$20 sps:$4 sm:$0xff]   ;;  %v7035_v30 = vld [vmem:[#allocation7 + $0x498] ss:$20 sps:$4 sm:$0xff]  }
 0x333   :  { %4907 = vmatprep.subr.bf16.mxu0 %v6968_v32  ;;  %5036 = vmatprep.subr.bf16.mxu1 %v6971_v33  ;;  %v7033_v6 = vld [vmem:[#allocation7 + $0x330] ss:$20 sps:$4 sm:$0xff]   ;;  %v7036_v32 = vld [vmem:[#allocation7 + $0xd8] ss:$20 sps:$4 sm:$0xff]  }
 0x334   :  { %v7037_v33 = vld [vmem:[#allocation7 + $0x358] ss:$20 sps:$4 sm:$0xff]  }
 0x335   :  { %4897 = vmatmul.mubr.bf16.vlgmr.msra.gmra.mrb[20].mxu0 %v7373_v49  ;;  %5026 = vmatmul.mubr.bf16.vlgmr.msra.gmra.mrb[20].mxu1 %v7373_v49 }
 0x336   :  { %4908 = vmatpush1.bf16.msra.mxu0 %v6966_v35  ;;  %5037 = vmatpush1.bf16.msra.mxu1 %v6969_v36  ;;  %v7038_v35 = vld [vmem:[#allocation7 + $0x240] ss:$20 sps:$4 sm:$0xff]  }
 0x337   :  { %4909 = vmatprep.subr.bf16.mxu0 %v6974_v37  ;;  %5038 = vmatprep.subr.bf16.mxu1 %v6977_v11  ;;  %v7039_v36 = vld [vmem:[#allocation7 + $0x4c0] ss:$20 sps:$4 sm:$0xff]  }
 0x338   :  { %4939 = vmatprep.mubr.bf16.mxu0 %v7129_v18  ;;  %5068 = vmatprep.mubr.bf16.mxu1 %v7129_v18  ;;  %v6993_v18 = vld [vmem:[#allocation7 + $0x5a8] ss:$20 sps:$4 sm:$0xff]   ;;  %v7040_v37 = vld [vmem:[#allocation7 + $0x100] ss:$20 sps:$4 sm:$0xff]  }
 0x339   :  { %v7041_v11 = vld [vmem:[#allocation7 + $0x380] ss:$20 sps:$4 sm:$0xff]  }
 0x33a   :  { %4910 = vmatpush1.bf16.msra.mxu0 %v6972_v38  ;;  %5039 = vmatpush1.bf16.msra.mxu1 %v6975_v46  ;;  %v7042_v38 = vld [vmem:[#allocation7 + $0x268] ss:$20 sps:$4 sm:$0xff]  }
 0x33b   :  { %4911 = vmatprep.subr.bf16.mxu0 %v6980_v48  ;;  %5040 = vmatprep.subr.bf16.mxu1 %v6983_v39  ;;  %v7043_v46 = vld [vmem:[#allocation7 + $0x4e8] ss:$20 sps:$4 sm:$0xff]  }
 0x33c   :  { %v7044_v48 = vld [vmem:[#allocation7 + $0x128] ss:$20 sps:$4 sm:$0xff]  }
 0x33d   :  { %v7045_v39 = vld [vmem:[#allocation7 + $0x3a8] ss:$20 sps:$4 sm:$0xff]  }
 0x33e   :  { %4912 = vmatpush1.bf16.msra.mxu0 %v6978_v31  ;;  %5041 = vmatpush1.bf16.msra.mxu1 %v6981_v40  ;;  %v7046_v31 = vld [vmem:[#allocation7 + $0x510] ss:$20 sps:$4 sm:$0xff]   ;;  %v7047_v40 = vld [vmem:[#allocation7 + $0x538] ss:$20 sps:$4 sm:$0xff]  }
 0x33f   :  { %4913 = vmatprep.subr.bf16.mxu0 %v6986_v41  ;;  %5042 = vmatprep.subr.bf16.mxu1 %v6989_v42  ;;  %v7048_v41 = vld [vmem:[#allocation7 + $0x560] ss:$20 sps:$4 sm:$0xff]   ;;  %v7049_v42 = vld [vmem:[#allocation7 + $0x588] ss:$20 sps:$4 sm:$0xff]  }
 0x342   :  { %4914 = vmatpush1.bf16.msra.mxu0 %v6984_v44  ;;  %5043 = vmatpush1.bf16.msra.mxu1 %v6987_v45  ;;  %v7050_v44 = vld [vmem:[#allocation7 + $0x5b0] ss:$20 sps:$4 sm:$0xff]   ;;  %v7053_v45 = vld [vmem:[#allocation7 + $0x628] ss:$20 sps:$4 sm:$0xff]  }
 0x343   :  { %4915 = vmatprep.subr.bf16.mxu0 %v6992_v52  ;;  %5044 = vmatprep.subr.bf16.mxu1 %v6995_v25  ;;  %v7413_v52 = vld [vmem:[%s7448_s7] sm:$0x1f] }
 0x344   :  { %v5213_v25 = vunpack.c.l.bf16 %v7413_v52 }
 0x346   :  { %4916 = vmatpush1.bf16.msra.mxu0 %v6990_v53  ;;  %5045 = vmatpush1.bf16.msra.mxu1 %v6993_v18  ;;  %v3754_v53 = vld [vmem:[%s7447_s6] sm:$0x1f] }
 0x347   :  { %4917 = vmatprep.subr.bf16.mxu0 %v6998_v54  ;;  %5046 = vmatprep.subr.bf16.mxu1 %v7001_v43  ;;  %v3759_v18 = vrot.slane %v3754_v53, %v7297_v26  ;;  %v5220_v54 = vrot.slane %v5213_v25, %v7297_v26  ;;  %v5231_v43 = vsub.s32 6, %v7289_v24 }
 0x34a   :  { %4918 = vmatpush1.bf16.msra.mxu0 %v6996_v55  ;;  %5047 = vmatpush1.bf16.msra.mxu1 %v6999_v56  ;;  %v5224_v55 = vrot.slane %v5213_v25, %v7300_v27  ;;  %v3771_v56 = vrot.slane %v3754_v53, %v7306_v29 }
 0x34b   :  { %4919 = vmatprep.subr.bf16.mxu0 %v7004_v57  ;;  %5048 = vmatprep.subr.bf16.mxu1 %v7007_v58  ;;  %v5228_v57 = vrot.slane %v5213_v25, %v7331_v7 }
 0x34c   :  { %v5249_v24 = vrot.slane %v5224_v55, %v7297_v26 }
 0x34d   :  { %v5253_v29 = vrot.slane %v5228_v57, %v7297_v26 }
 0x34e   :  { %4920 = vmatpush1.bf16.msra.mxu0 %v7002_v59  ;;  %5049 = vmatpush1.bf16.msra.mxu1 %v7005_v62 }
 0x34f   :  { %4921 = vmatprep.subr.bf16.mxu0 %v7010_v63  ;;  %5050 = vmatprep.subr.bf16.mxu1 %v7013_v0  ;;  %v5245_v63 = vrot.slane %v5220_v54, %v7297_v26 }
 0x352   :  { %4922 = vmatpush1.bf16.msra.mxu0 %v7008_v60  ;;  %5051 = vmatpush1.bf16.msra.mxu1 %v7011_v1 }
 0x353   :  { %6014 = vmatprep.subr.bf16.mxu0 %v7014_v61  ;;  %6036 = vmatprep.subr.bf16.mxu1 %v7015_v2  ;;  %v5232_v61 = vrot.slane %v5213_v25, %v5231_v43 }
 0x355   :  { %4940 = vmatmul.mubr.bf16.vlgmr.msra.gmra.mrb[20].mxu0 %v7387_v34  ;;  %5069 = vmatmul.mubr.bf16.vlgmr.msra.gmra.mrb[20].mxu1 %v7387_v34 }
 0x356   :  { %6015 = vmatpush3.bf16.msra.mxu0 %v7016_v3  ;;  %5111 = vmatprep.mubr.bf16.mxu0 %v7375_v50  ;;  %v7029_v50 = vld [vmem:[#allocation7 + $0x308] ss:$20 sps:$4 sm:$0xff]  }
 0x357   :  { %6037 = vmatpush3.bf16.msra.mxu1 %v7017_v4  ;;  %5152 = vmatprep.mubr.bf16.mxu1 %v7377_v51  ;;  %v7031_v51 = vld [vmem:[#allocation7 + $0x470] ss:$20 sps:$4 sm:$0xff]  }
 0x358   :  { %6016 = vmatprep.subr.bf16.mxu0 %v7018_v5  ;;  %6038 = vmatprep.subr.bf16.mxu1 %v7019_v8 }
 0x35a   :  { %6017 = vmatpush3.bf16.msra.mxu0 %v7020_v9 }
 0x35b   :  { %6039 = vmatpush3.bf16.msra.mxu1 %v7021_v10  ;;  %6018 = vmatprep.subr.bf16.mxu0 %v7022_v12 }
 0x35c   :  { %6040 = vmatprep.subr.bf16.mxu1 %v7023_v13 }
 0x35e   :  { %6019 = vmatpush3.bf16.msra.mxu0 %v7024_v14 }
 0x35f   :  { %6041 = vmatpush3.bf16.msra.mxu1 %v7025_v16  ;;  %6020 = vmatprep.subr.bf16.mxu0 %v7026_v17 }
 0x360   :  { %6042 = vmatprep.subr.bf16.mxu1 %v7027_v19  ;;  %v5257_v19 = vrot.slane %v5232_v61, %v7297_v26 }
 0x362   :  { %6021 = vmatpush3.bf16.msra.mxu0 %v7028_v20 }
 0x363   :  { %6043 = vmatpush3.bf16.msra.mxu1 %v7029_v50  ;;  %6022 = vmatprep.subr.bf16.mxu0 %v7030_v21 }
 0x364   :  { %6044 = vmatprep.subr.bf16.mxu1 %v7031_v51 }
 0x366   :  { %6023 = vmatpush3.bf16.msra.mxu0 %v7032_v22 }
 0x367   :  { %6045 = vmatpush3.bf16.msra.mxu1 %v7033_v6  ;;  %6024 = vmatprep.subr.bf16.mxu0 %v7034_v23 }
 0x368   :  { %6046 = vmatprep.subr.bf16.mxu1 %v7035_v30 }
 0x36a   :  { %6025 = vmatpush3.bf16.msra.mxu0 %v7036_v32 }
 0x36b   :  { %6047 = vmatpush3.bf16.msra.mxu1 %v7037_v33  ;;  %6026 = vmatprep.subr.bf16.mxu0 %v7038_v35 }
 0x36c   :  { %6048 = vmatprep.subr.bf16.mxu1 %v7039_v36 }
 0x36e   :  { %6027 = vmatpush3.bf16.msra.mxu0 %v7040_v37 }
 0x36f   :  { %6049 = vmatpush3.bf16.msra.mxu1 %v7041_v11  ;;  %6028 = vmatprep.subr.bf16.mxu0 %v7042_v38 }
 0x370   :  { %6050 = vmatprep.subr.bf16.mxu1 %v7043_v46 }
 0x372   :  { %6029 = vmatpush3.bf16.msra.mxu0 %v7044_v48 }
 0x373   :  { %6051 = vmatpush3.bf16.msra.mxu1 %v7045_v39  ;;  %6107 = vmatprep.subr.bf16.mxu0 %v7130_v15 }
 0x375   :  { %5112 = vmatmul.mubr.bf16.vlgmr.msra.gmra.mrb[24].mxu0 %v7371_v47  ;;  %v7051_v47 = vld [vmem:[#allocation7 + $0x5d8] ss:$20 sps:$4 sm:$0xff]  }
 0x376   :  { %5153 = vmatmul.mubr.bf16.vlgmr.msra.gmra.mrb[24].mxu1 %v7373_v49  ;;  %6108 = vmatpush3.bf16.msra.mxu0 %v7046_v31  ;;  %v7052_v49 = vld [vmem:[#allocation7 + $0x600] ss:$20 sps:$4 sm:$0xff]  }
 0x377   :  { %6109 = vmatprep.subr.bf16.mxu0 %v7130_v15  ;;  %6123 = vmatprep.mubr.msk.bf16.mxu0 %vm7131_vm0, %v7130_v15 }
 0x37a   :  { %6110 = vmatpush3.bf16.msra.mxu0 %v7047_v40  ;;  %v3775_v40 = vrot.slane %v3754_v53, %v7331_v7 }
 0x37b   :  { %6111 = vmatprep.subr.bf16.mxu0 %v7130_v15 }
 0x37e   :  { %6112 = vmatpush3.bf16.msra.mxu0 %v7048_v41 }
 0x37f   :  { %6113 = vmatprep.subr.bf16.mxu0 %v7130_v15 }
 0x382   :  { %6114 = vmatpush3.bf16.msra.mxu0 %v7049_v42 }
 0x383   :  { %6115 = vmatprep.subr.bf16.mxu0 %v7130_v15 }
 0x386   :  { %6116 = vmatpush3.bf16.msra.mxu0 %v7050_v44 }
 0x387   :  { %6117 = vmatprep.subr.bf16.mxu0 %v7130_v15 }
 0x38a   :  { %6118 = vmatpush3.bf16.msra.mxu0 %v7051_v47 }
 0x38b   :  { %6119 = vmatprep.subr.bf16.mxu0 %v7130_v15 }
 0x38e   :  { %6120 = vmatpush3.bf16.msra.mxu0 %v7052_v49 }
 0x38f   :  { %6121 = vmatprep.subr.bf16.mxu0 %v7130_v15  ;;  %v3767_v15 = vrot.slane %v3754_v53, %v7300_v27 }
 0x392   :  { %6122 = vmatpush3.bf16.msra.mxu0 %v7053_v45 }
 0x395   :  { %6124 = vmatmul.mubr.bf16.vlgmr.msra.gmra.mrb[28].mxu0 %v7387_v34  ;;  %v3763_v34 = vrot.slane %v3754_v53, %v7303_v28 }
 0x428   :  { %v4941_v58 = vpop.f32.mrb[20].mxu0  ;;  %v5070_v59 = vpop.f32.mrb[20].mxu1 }
 0x429   :  { %v6143_v62 = vadd.f32 %v4941_v58, %v3759_v18  ;;  %v6147_v0 = vadd.f32 %v5070_v59, %v3767_v15  ;;  %v4943_v60 = vpop.f32.mrb[21].mxu0  ;;  %v5072_v1 = vpop.f32.mrb[21].mxu1  ;;  %v5214_v58 = vunpack.c.h.bf16 %v7413_v52 }
 0x42a   :  { %v6144_v2 = vadd.f32 %v4943_v60, %v3763_v34  ;;  %v6148_v3 = vadd.f32 %v5072_v1, %v3771_v56  ;;  %v4945_v28 = vpop.f32.mrb[22].mxu0  ;;  %v5074_v4 = vpop.f32.mrb[22].mxu1 }
 0x42b   :  { %v5202_v27 = vmax.f32 %v6143_v62, 0.0  ;;  %v6145_v5 = vadd.f32 %v4945_v28, %v3759_v18  ;;  %v6149_v8 = vadd.f32 %v5074_v4, %v3767_v15  ;;  %v4947_v9 = vpop.f32.mrb[23].mxu0  ;;  %v5076_v10 = vpop.f32.mrb[23].mxu1  ;;  %v5204_v12 = vmax.f32 %v6147_v0, 0.0 }
 0x42c   :  { %v5203_v13 = vmax.f32 %v6144_v2, 0.0  ;;  %v6146_v14 = vadd.f32 %v4947_v9, %v3763_v34  ;;  %v6150_v16 = vadd.f32 %v5076_v10, %v3771_v56  ;;  %v5205_v21 = vmax.f32 %v6148_v3, 0.0 }
 0x42d   :  { %v5262_v17 = vmul.f32 %v5245_v63, %v5202_v27  ;;  %v5207_v20 = vmax.f32 %v6145_v5, 0.0  ;;  %v5209_v51 = vmax.f32 %v6149_v8, 0.0  ;;  %v5264_v23 = vmul.f32 %v5253_v29, %v5204_v12  ;;  %v5907_v27 = vld [vmem:[#allocation2] ss:$0 sm:$0xff] }
 0x42e   :  { %v5263_v50 = vmul.f32 %v5249_v24, %v5203_v13  ;;  %v5208_v22 = vmax.f32 %v6146_v14, 0.0  ;;  %v5210_v33 = vmax.f32 %v6150_v16, 0.0  ;;  %v5265_v35 = vmul.f32 %v5257_v19, %v5205_v21 }
 0x42f   :  { %v5267_v6 = vmul.f32 %v5245_v63, %v5207_v20  ;;  %v5269_v36 = vmul.f32 %v5253_v29, %v5209_v51  ;;  %v5236_v59 = vrot.slane %v5214_v58, %v7297_v26 }
 0x430   :  { %v5272_v30 = vadd.f32 %v5263_v50, %v5262_v17  ;;  %v5268_v32 = vmul.f32 %v5249_v24, %v5208_v22  ;;  %v5270_v38 = vmul.f32 %v5257_v19, %v5210_v33 }
 0x431   :  { %v5261_v63 = vrot.slane %v5236_v59, %v7297_v26 }
 0x432   :  { %v5278_v37 = vadd.f32 %v5268_v32, %v5267_v6  ;;  %v5273_v11 = vadd.f32 %v5272_v30, %v5264_v23 }
 0x434   :  { %v5274_v46 = vadd.f32 %v5273_v11, %v5265_v35  ;;  %v5279_v48 = vadd.f32 %v5278_v37, %v5269_v36 }
 0x436   :  { %v5280_v39 = vadd.f32 %v5279_v48, %v5270_v38 }
 0x448   :  { %v6030_v31 = vpop.f32.mrb[24].mxu0 }
 0x449   :  { %v6052_v41 = vpop.f32.mrb[24].mxu1  ;;  %v6031_v42 = vpop.f32.mrb[25].mxu0 }
 0x44a   :  { %v6032_v44 = vadd.f32 %v6031_v42, %v6030_v31  ;;  %v6053_v47 = vpop.f32.mrb[25].mxu1  ;;  %v6033_v49 = vpop.f32.mrb[26].mxu0 }
 0x44b   :  { %v6054_v45 = vadd.f32 %v6053_v47, %v6052_v41  ;;  %v6055_v25 = vpop.f32.mrb[26].mxu1  ;;  %v6034_v18 = vpop.f32.mrb[27].mxu0 }
 0x44c   :  { %v5114_v54 = vadd.f32 %v6032_v44, %v3775_v40  ;;  %v6035_v15 = vadd.f32 %v6034_v18, %v6033_v49  ;;  %v6056_v43 = vpop.f32.mrb[27].mxu1 }
 0x44d   :  { %v6057_v34 = vadd.f32 %v6056_v43, %v6055_v25 }
 0x44e   :  { %v5117_v55 = vadd.f32 %v6035_v15, %v3775_v40  ;;  %v5155_v56 = vadd.f32 %v6054_v45, %v5114_v54 }
 0x450   :  { %v5158_v57 = vadd.f32 %v6057_v34, %v5117_v55 }
 0x468   :  { %v5195_v7 = vpop.f32.mrb[28].mxu0 }
 0x469   :  { %v5196_v53 = vadd.f32 %v5195_v7, %v5155_v56  ;;  %v6125_v62 = vpop.f32.mrb[29].mxu0 }
 0x46a   :  { %v5198_v0 = vpop.f32.mrb[30].mxu0 }
 0x46b   :  { %v5206_v60 = vmax.f32 %v5196_v53, 0.0  ;;  %v5199_v1 = vadd.f32 %v5198_v0, %v5158_v57  ;;  %v6126_v61 = vpop.f32.mrb[31].mxu0 }
 0x46d   :  { %v5211_v2 = vmax.f32 %v5199_v1, 0.0  ;;  %v5266_v24 = vmul.f32 %v5261_v63, %v5206_v60 }
 0x46f   :  { %v5271_v3 = vmul.f32 %v5261_v63, %v5211_v2  ;;  %v5275_v28 = vadd.f32 %v5274_v46, %v5266_v24 }
 0x471   :  { %5276 = vadd.xlane.f32.xlu0 %v5275_v28  ;;  %v5281_v4 = vadd.f32 %v5280_v39, %v5271_v3 }
 0x475   :  { %5282 = vadd.xlane.f32.xlu0 %v5281_v4 }
 0x4fe   :  { %v5277_v52 = vpop.xlane.xlu0 %5276 }
 0x4ff   :  { %v5291_v29 = vadd.f32 %v5907_v27, %v5277_v52 }
 0x501   :  { %5294 = vst.msk [vmem:[%s7450_s9] sm:$0xff] %vm5293_vm1, %v5291_v29 }
 0x502   :  { %v5283_v26 = vpop.xlane.xlu0 %5282 }
 0x503   :  { %v5292_v5 = vadd.f32 %v5907_v27, %v5283_v26 }
 0x505   :  { %5295 = vst.msk [vmem:[%s7450_s9 + $0x8] sm:$0xff] %vm5293_vm1, %v5292_v5 }
 0x506   :  { %5300 = vsyncpa [#allocation4], 1 }
 0x507   :  { %5301 = vsyncpa [#allocation6], 1 }

</bundles_post_ra>
